<compile_context>
chip_gen: v7x
topology: tpu7x:2x2x1
jax: 0.10.0
libtpu: 0.0.40
codegen_flags: <defaults>
</compile_context>

<pallas_src>
import functools
import math

import jax
import jax.numpy as jnp
from jax.experimental import pallas as pl
from jax.experimental.pallas import tpu as pltpu


# ----------------------------------------------------------------------------
# Helpers
# ----------------------------------------------------------------------------
def _round_up(x, m):
    return ((x + m - 1) // m) * m


def _pad2(a, rows, cols):
    r, c = a.shape
    return jnp.pad(a, ((0, rows - r), (0, cols - c)))


# ----------------------------------------------------------------------------
# Fused forward kernel (all GCN layers + residuals + relu + log_softmax)
# ----------------------------------------------------------------------------
def _make_fused_forward_kernel(depth, residual_type, nclass_valid, compute_dtype):
    last = depth - 1

    def mdot(a, b):
        # MXU matmul in `compute_dtype` with f32 accumulation.
        return jnp.dot(a.astype(compute_dtype), b.astype(compute_dtype),
                       preferred_element_type=jnp.float32)

    def masked_log_softmax(y):
        # Row-wise log_softmax over the first `nclass_valid` lanes only
        # (remaining lanes are layout padding and must not contaminate max/sum).
        col = jax.lax.broadcasted_iota(jnp.int32, y.shape, 1)
        valid = col < nclass_valid
        ym = jnp.where(valid, y, jnp.float32(-1e30))
        m = jnp.max(ym, axis=1, keepdims=True)
        e = jnp.where(valid, jnp.exp(ym - m), 0.0)
        lse = jnp.log(jnp.sum(e, axis=1, keepdims=True)) + m
        return y - lse

    def kernel(*refs):
        raw_x_ref, adj_ref = refs[0], refs[1]
        w = refs[2:2 + depth]
        b = refs[2 + depth:2 + 2 * depth]
        r = refs[2 + 2 * depth:2 + 3 * depth]
        o_ref = refs[2 + 3 * depth]

        adj = adj_ref[...]
        raw_x = raw_x_ref[...]
        x = raw_x.astype(jnp.float32)

        if residual_type in ("raw", "graph_raw"):
            # Constant across layers: hoisted out of the layer loop.
            raw_proj = mdot(raw_x, r[0][...])          # raw_x @ R0

        for i in range(last):
            support = mdot(x, w[i][...])
            if residual_type == "naive":
                out = mdot(adj, support) + b[i][...] + mdot(x, r[i][...])
            elif residual_type == "raw":
                out = mdot(adj, support) + b[i][...] + raw_proj
            elif residual_type == "graph_naive":
                # adj@(xW) + adj@(xR) == adj@(xW + xR): single adjacency MXU pass
                out = mdot(adj, support + mdot(x, r[i][...])) + b[i][...]
            else:  # graph_raw
                out = mdot(adj, support + raw_proj) + b[i][...]
            x = jnp.maximum(out, 0.0)   # relu; dropout == identity in eval mode

        support = mdot(x, w[last][...])
        if residual_type == "naive":
            y = mdot(adj, support) + b[last][...] + mdot(x, r[last][...])
        elif residual_type == "raw":
            res = raw_proj if depth == 1 else mdot(raw_proj, r[last][...])
            y = mdot(adj, support) + b[last][...] + res
        elif residual_type == "graph_naive":
            y = mdot(adj, support + mdot(x, r[last][...])) + b[last][...]
        else:  # graph_raw
            res = raw_proj if depth == 1 else mdot(raw_proj, r[last][...])
            y = mdot(adj, support + res) + b[last][...]

        o_ref[...] = masked_log_softmax(y).astype(o_ref.dtype)

    return kernel


@functools.partial(jax.jit,
                   static_argnames=("depth", "residual_type", "compute_dtype"))
def fused_forward(raw_x, adj, gc_w, gc_b, res_w, *, depth, residual_type,
                  compute_dtype=jnp.bfloat16):
    """Whole MethodDeepGCNResNet forward as a single Pallas kernel."""
    if residual_type == "none":
        # PyTorch forward() dispatcher returns None for residual_type == 'none'.
        return None

    N, nfeat = raw_x.shape
    nclass = gc_w[-1].shape[1]

    Np = _round_up(N, 128)              # lane-dense adjacency / sublane rows
    fp = lambda d: _round_up(d, 128)    # lane-dense feature dims
    Cp = fp(nclass)

    # Zero-pad everything to MXU/lane-friendly shapes (padding is provably
    # inert: padded adj rows/cols are zero, padded weight rows/cols are zero,
    # padded output rows/lanes are sliced off / masked in log_softmax).
    raw_x_p = _pad2(raw_x, Np, fp(nfeat)).astype(compute_dtype)
    adj_p = _pad2(adj, Np, Np).astype(compute_dtype)
    w_p = [_pad2(w, fp(w.shape[0]), fp(w.shape[1])).astype(compute_dtype)
           for w in gc_w]
    r_p = [_pad2(w, fp(w.shape[0]), fp(w.shape[1])).astype(compute_dtype)
           for w in res_w]
    b_p = [_pad2(b.reshape(1, -1), 1, fp(b.shape[0])).astype(jnp.float32)
           for b in gc_b]

    arrays = [raw_x_p, adj_p] + w_p + b_p + r_p
    in_specs = [pl.BlockSpec(a.shape, lambda i: (0, 0)) for a in arrays]

    # Advisory cost estimate for the XLA scheduler.
    flops = 0
    for wp in w_p:
        fin, fout = wp.shape
        flops += 2 * Np * fin * fout          # x @ W
        flops += 2 * Np * fin * fout          # residual projection (upper bound)
        flops += 2 * Np * Np * fout           # adj @ (...)
    bytes_accessed = sum(a.size * a.dtype.itemsize for a in arrays) + Np * Cp * 4
    cost = pl.CostEstimate(flops=flops, transcendentals=Np * Cp,
                           bytes_accessed=bytes_accessed)

    kernel = _make_fused_forward_kernel(depth, residual_type, nclass,
                                        compute_dtype)
    out_p = pl.pallas_call(
        kernel,
        out_shape=jax.ShapeDtypeStruct((Np, Cp), jnp.float32),
        grid=(1,),
        in_specs=in_specs,
        out_specs=pl.BlockSpec((Np, Cp), lambda i: (0, 0)),
        compiler_params=pltpu.CompilerParams(
            dimension_semantics=("arbitrary",)),
        cost_estimate=cost,
    )(*arrays)
    return out_p[:N, :nclass]


# ----------------------------------------------------------------------------
# Parameter construction (matches __init__ shapes & init law)
# ----------------------------------------------------------------------------
def init_params(key, nfeat, nhid, nclass, depth):
    dims = []
    if depth == 1:
        dims.append((nfeat, nclass))
    else:
        dims.append((nfeat, nhid))
        for _ in range(1, depth - 1):
            dims.append((nhid, nhid))
        dims.append((nhid, nclass))

    gc_w, gc_b, res_w = [], [], []
    for (fin, fout) in dims:
        key, k1, k2, k3 = jax.random.split(key, 4)
        stdv = 1.0 / math.sqrt(fout)
        gc_w.append(jax.random.uniform(k1, (fin, fout), jnp.float32, -stdv, stdv))
        gc_b.append(jax.random.uniform(k2, (fout,), jnp.float32, -stdv, stdv))
        res_w.append(jax.random.uniform(k3, (fin, fout), jnp.float32, -stdv, stdv))
    return gc_w, gc_b, res_w


# ----------------------------------------------------------------------------
# Pure-JAX f32 reference (literal PyTorch formulation, eval mode)
# ----------------------------------------------------------------------------
def reference_forward(raw_x, adj, gc_w, gc_b, res_w, depth, residual_type):
    def gc(x, w, b):
        return adj @ (x @ w) + b

    last = depth - 1
    x = raw_x
    if residual_type == "naive":
        for i in range(last):
            x = jax.nn.relu(gc(x, gc_w[i], gc_b[i]) + x @ res_w[i])
        y = gc(x, gc_w[last], gc_b[last]) + x @ res_w[last]
    elif residual_type == "raw":
        for i in range(last):
            x = jax.nn.relu(gc(x, gc_w[i], gc_b[i]) + raw_x @ res_w[0])
        if depth == 1:
            y = gc(x, gc_w[last], gc_b[last]) + raw_x @ res_w[0]
        else:
            y = gc(x, gc_w[last], gc_b[last]) + (raw_x @ res_w[0]) @ res_w[last]
    elif residual_type == "graph_naive":
        for i in range(last):
            x = jax.nn.relu(gc(x, gc_w[i], gc_b[i]) + adj @ (x @ res_w[i]))
        y = gc(x, gc_w[last], gc_b[last]) + adj @ (x @ res_w[last])
    elif residual_type == "graph_raw":
        for i in range(last):
            x = jax.nn.relu(gc(x, gc_w[i], gc_b[i]) + adj @ (raw_x @ res_w[0]))
        if depth == 1:
            y = gc(x, gc_w[last], gc_b[last]) + adj @ (raw_x @ res_w[0])
        else:
            y = gc(x, gc_w[last], gc_b[last]) + adj @ ((raw_x @ res_w[0]) @ res_w[last])
    else:
        return None
    return jax.nn.log_softmax(y, axis=1)


# ----------------------------------------------------------------------------
# Main
# ----------------------------------------------------------------------------
if __name__ == "__main__":
    N = 8          # number of graph nodes
    nfeat = 16
    nhid = 32
    nclass = 8
    depth = 3
    dropout = 0.5  # identity in eval mode

    key = jax.random.PRNGKey(0)
    key, kx, ka, kp = jax.random.split(key, 4)

    raw_x = jax.random.normal(kx, (N, nfeat), jnp.float32)

    # Dense row-normalized adjacency (self-loops + random edges).
    a = (jax.random.uniform(ka, (N, N)) > 0.6).astype(jnp.float32)
    a = a + jnp.eye(N, dtype=jnp.float32)
    adj = a / jnp.sum(a, axis=1, keepdims=True)

    gc_w, gc_b, res_w = init_params(kp, nfeat, nhid, nclass, depth)

    for rtype in ("naive", "raw", "graph_naive", "graph_raw"):
        ref = reference_forward(raw_x, adj, gc_w, gc_b, res_w, depth, rtype)

        # f32 MXU path.
        out_f32 = fused_forward(raw_x, adj, gc_w, gc_b, res_w, depth=depth,
                                residual_type=rtype, compute_dtype=jnp.float32)
        out_f32 = jax.block_until_ready(out_f32)
        assert out_f32.shape == (N, nclass)
        assert jnp.allclose(jnp.sum(jnp.exp(out_f32), axis=1), 1.0, atol=1e-4)
        assert jnp.allclose(out_f32, ref, atol=5e-2), (
            rtype, "f32", float(jnp.max(jnp.abs(out_f32 - ref))))

        # bf16 MXU path (f32 accumulation + f32 epilogue), looser tolerance.
        out_bf16 = fused_forward(raw_x, adj, gc_w, gc_b, res_w, depth=depth,
                                 residual_type=rtype, compute_dtype=jnp.bfloat16)
        out_bf16 = jax.block_until_ready(out_bf16)
        assert out_bf16.shape == (N, nclass)
        assert jnp.allclose(jnp.sum(jnp.exp(out_bf16), axis=1), 1.0, atol=1e-3)
        assert jnp.allclose(out_bf16, ref, atol=2e-1), (
            rtype, "bf16", float(jnp.max(jnp.abs(out_bf16 - ref))))

    # residual_type == 'none' mirrors the PyTorch dispatcher (returns None).
    assert fused_forward(raw_x, adj, gc_w, gc_b, res_w, depth=depth,
                         residual_type="none") is None

    print("KERNEL_OK")
</pallas_src>

<mosaic_0001>
module attributes {stable_mosaic.version = 11 : i64} {
  func.func @kernel(%arg0: i32, %arg1: memref<128x128xf32, #tpu.memory_space<vmem>>, %arg2: memref<128x128xf32, #tpu.memory_space<vmem>>, %arg3: memref<128x128xf32, #tpu.memory_space<vmem>>, %arg4: memref<128x128xf32, #tpu.memory_space<vmem>>, %arg5: memref<128x128xf32, #tpu.memory_space<vmem>>, %arg6: memref<1x128xf32, #tpu.memory_space<vmem>>, %arg7: memref<1x128xf32, #tpu.memory_space<vmem>>, %arg8: memref<1x128xf32, #tpu.memory_space<vmem>>, %arg9: memref<128x128xf32, #tpu.memory_space<vmem>>, %arg10: memref<128x128xf32, #tpu.memory_space<vmem>>, %arg11: memref<128x128xf32, #tpu.memory_space<vmem>>, %arg12: memref<128x128xf32, #tpu.memory_space<vmem>>) attributes {dimension_semantics = [#tpu.dimension_semantics<arbitrary>], iteration_bounds = array<i64: 1>, scalar_prefetch = 0 : i64, scratch_operands = 0 : i64, tpu.core_type = #tpu.core_type<tc>, window_params = [{pipeline_mode = #tpu.pipeline_mode<synchronous>, transform_indices = @transform_0, window_bounds = array<i64: 128, 128>}, {pipeline_mode = #tpu.pipeline_mode<synchronous>, transform_indices = @transform_1, window_bounds = array<i64: 128, 128>}, {pipeline_mode = #tpu.pipeline_mode<synchronous>, transform_indices = @transform_2, window_bounds = array<i64: 128, 128>}, {pipeline_mode = #tpu.pipeline_mode<synchronous>, transform_indices = @transform_3, window_bounds = array<i64: 128, 128>}, {pipeline_mode = #tpu.pipeline_mode<synchronous>, transform_indices = @transform_4, window_bounds = array<i64: 128, 128>}, {pipeline_mode = #tpu.pipeline_mode<synchronous>, transform_indices = @transform_5, window_bounds = array<i64: 1, 128>}, {pipeline_mode = #tpu.pipeline_mode<synchronous>, transform_indices = @transform_6, window_bounds = array<i64: 1, 128>}, {pipeline_mode = #tpu.pipeline_mode<synchronous>, transform_indices = @transform_7, window_bounds = array<i64: 1, 128>}, {pipeline_mode = #tpu.pipeline_mode<synchronous>, transform_indices = @transform_8, window_bounds = array<i64: 128, 128>}, {pipeline_mode = #tpu.pipeline_mode<synchronous>, transform_indices = @transform_9, window_bounds = array<i64: 128, 128>}, {pipeline_mode = #tpu.pipeline_mode<synchronous>, transform_indices = @transform_10, window_bounds = array<i64: 128, 128>}, {pipeline_mode = #tpu.pipeline_mode<synchronous>, transform_indices = @transform_11, window_bounds = array<i64: 128, 128>}]} {
    %c0 = arith.constant 0 : index
    %c0_0 = arith.constant 0 : index
    %0 = vector.load %arg2[%c0, %c0_0] : memref<128x128xf32, #tpu.memory_space<vmem>>, vector<128x128xf32>
    %c0_1 = arith.constant 0 : index
    %c0_2 = arith.constant 0 : index
    %1 = vector.load %arg1[%c0_1, %c0_2] : memref<128x128xf32, #tpu.memory_space<vmem>>, vector<128x128xf32>
    %c0_3 = arith.constant 0 : index
    %c0_4 = arith.constant 0 : index
    %2 = vector.load %arg3[%c0_3, %c0_4] : memref<128x128xf32, #tpu.memory_space<vmem>>, vector<128x128xf32>
    %cst = arith.constant dense<0.000000e+00> : vector<128x128xf32>
    %3 = tpu.matmul %1, %2, %cst {dimension_numbers = #tpu.dot_dimension_numbers<[1], [0], [0], [1], [0, 0, 1, 1], [], []>} : vector<128x128xf32>, vector<128x128xf32>, vector<128x128xf32> -> vector<128x128xf32>
    %cst_5 = arith.constant dense<0.000000e+00> : vector<128x128xf32>
    %4 = tpu.matmul %0, %3, %cst_5 {dimension_numbers = #tpu.dot_dimension_numbers<[1], [0], [0], [1], [0, 0, 1, 1], [], []>} : vector<128x128xf32>, vector<128x128xf32>, vector<128x128xf32> -> vector<128x128xf32>
    %c0_6 = arith.constant 0 : index
    %c0_7 = arith.constant 0 : index
    %5 = vector.load %arg6[%c0_6, %c0_7] : memref<1x128xf32, #tpu.memory_space<vmem>>, vector<1x128xf32>
    %6 = vector.broadcast %5 : vector<1x128xf32> to vector<128x128xf32>
    %7 = arith.addf %4, %6 : vector<128x128xf32>
    %c0_8 = arith.constant 0 : index
    %c0_9 = arith.constant 0 : index
    %8 = vector.load %arg9[%c0_8, %c0_9] : memref<128x128xf32, #tpu.memory_space<vmem>>, vector<128x128xf32>
    %cst_10 = arith.constant dense<0.000000e+00> : vector<128x128xf32>
    %9 = tpu.matmul %1, %8, %cst_10 {dimension_numbers = #tpu.dot_dimension_numbers<[1], [0], [0], [1], [0, 0, 1, 1], [], []>} : vector<128x128xf32>, vector<128x128xf32>, vector<128x128xf32> -> vector<128x128xf32>
    %10 = arith.addf %7, %9 : vector<128x128xf32>
    %cst_11 = arith.constant 0.000000e+00 : f32
    %11 = vector.broadcast %cst_11 : f32 to vector<128x128xf32>
    %12 = arith.maximumf %10, %11 : vector<128x128xf32>
    %c0_12 = arith.constant 0 : index
    %c0_13 = arith.constant 0 : index
    %13 = vector.load %arg4[%c0_12, %c0_13] : memref<128x128xf32, #tpu.memory_space<vmem>>, vector<128x128xf32>
    %cst_14 = arith.constant dense<0.000000e+00> : vector<128x128xf32>
    %14 = tpu.matmul %12, %13, %cst_14 {dimension_numbers = #tpu.dot_dimension_numbers<[1], [0], [0], [1], [0, 0, 1, 1], [], []>} : vector<128x128xf32>, vector<128x128xf32>, vector<128x128xf32> -> vector<128x128xf32>
    %cst_15 = arith.constant dense<0.000000e+00> : vector<128x128xf32>
    %15 = tpu.matmul %0, %14, %cst_15 {dimension_numbers = #tpu.dot_dimension_numbers<[1], [0], [0], [1], [0, 0, 1, 1], [], []>} : vector<128x128xf32>, vector<128x128xf32>, vector<128x128xf32> -> vector<128x128xf32>
    %c0_16 = arith.constant 0 : index
    %c0_17 = arith.constant 0 : index
    %16 = vector.load %arg7[%c0_16, %c0_17] : memref<1x128xf32, #tpu.memory_space<vmem>>, vector<1x128xf32>
    %17 = vector.broadcast %16 : vector<1x128xf32> to vector<128x128xf32>
    %18 = arith.addf %15, %17 : vector<128x128xf32>
    %c0_18 = arith.constant 0 : index
    %c0_19 = arith.constant 0 : index
    %19 = vector.load %arg10[%c0_18, %c0_19] : memref<128x128xf32, #tpu.memory_space<vmem>>, vector<128x128xf32>
    %cst_20 = arith.constant dense<0.000000e+00> : vector<128x128xf32>
    %20 = tpu.matmul %12, %19, %cst_20 {dimension_numbers = #tpu.dot_dimension_numbers<[1], [0], [0], [1], [0, 0, 1, 1], [], []>} : vector<128x128xf32>, vector<128x128xf32>, vector<128x128xf32> -> vector<128x128xf32>
    %21 = arith.addf %18, %20 : vector<128x128xf32>
    %cst_21 = arith.constant 0.000000e+00 : f32
    %22 = vector.broadcast %cst_21 : f32 to vector<128x128xf32>
    %23 = arith.maximumf %21, %22 : vector<128x128xf32>
    %c0_22 = arith.constant 0 : index
    %c0_23 = arith.constant 0 : index
    %24 = vector.load %arg5[%c0_22, %c0_23] : memref<128x128xf32, #tpu.memory_space<vmem>>, vector<128x128xf32>
    %cst_24 = arith.constant dense<0.000000e+00> : vector<128x128xf32>
    %25 = tpu.matmul %23, %24, %cst_24 {dimension_numbers = #tpu.dot_dimension_numbers<[1], [0], [0], [1], [0, 0, 1, 1], [], []>} : vector<128x128xf32>, vector<128x128xf32>, vector<128x128xf32> -> vector<128x128xf32>
    %cst_25 = arith.constant dense<0.000000e+00> : vector<128x128xf32>
    %26 = tpu.matmul %0, %25, %cst_25 {dimension_numbers = #tpu.dot_dimension_numbers<[1], [0], [0], [1], [0, 0, 1, 1], [], []>} : vector<128x128xf32>, vector<128x128xf32>, vector<128x128xf32> -> vector<128x128xf32>
    %c0_26 = arith.constant 0 : index
    %c0_27 = arith.constant 0 : index
    %27 = vector.load %arg8[%c0_26, %c0_27] : memref<1x128xf32, #tpu.memory_space<vmem>>, vector<1x128xf32>
    %28 = vector.broadcast %27 : vector<1x128xf32> to vector<128x128xf32>
    %29 = arith.addf %26, %28 : vector<128x128xf32>
    %c0_28 = arith.constant 0 : index
    %c0_29 = arith.constant 0 : index
    %30 = vector.load %arg11[%c0_28, %c0_29] : memref<128x128xf32, #tpu.memory_space<vmem>>, vector<128x128xf32>
    %cst_30 = arith.constant dense<0.000000e+00> : vector<128x128xf32>
    %31 = tpu.matmul %23, %30, %cst_30 {dimension_numbers = #tpu.dot_dimension_numbers<[1], [0], [0], [1], [0, 0, 1, 1], [], []>} : vector<128x128xf32>, vector<128x128xf32>, vector<128x128xf32> -> vector<128x128xf32>
    %32 = arith.addf %29, %31 : vector<128x128xf32>
    %33 = tpu.iota {dimensions = array<i32: 1>} : vector<128x128xi32>
    %c8_i32 = arith.constant 8 : i32
    %34 = vector.broadcast %c8_i32 : i32 to vector<128x128xi32>
    %35 = arith.cmpi slt, %33, %34 : vector<128x128xi32>
    %cst_31 = arith.constant -1.000000e+30 : f32
    %36 = vector.broadcast %cst_31 : f32 to vector<128x128xf32>
    %37 = arith.select %35, %32, %36 : vector<128x128xi1>, vector<128x128xf32>
    %cst_32 = arith.constant dense<0xFF800000> : vector<128xf32>
    %38 = vector.multi_reduction <maximumf>, %37, %cst_32 [1] : vector<128x128xf32> to vector<128xf32>
    %39 = vector.shape_cast %38 : vector<128xf32> to vector<128x1xf32>
    %40 = vector.broadcast %39 : vector<128x1xf32> to vector<128x128xf32>
    %41 = arith.subf %37, %40 : vector<128x128xf32>
    %42 = math.exp %41 : vector<128x128xf32>
    %cst_33 = arith.constant 0.000000e+00 : f32
    %43 = vector.broadcast %cst_33 : f32 to vector<128x128xf32>
    %44 = arith.select %35, %42, %43 : vector<128x128xi1>, vector<128x128xf32>
    %cst_34 = arith.constant dense<0.000000e+00> : vector<128xf32>
    %45 = vector.multi_reduction <add>, %44, %cst_34 [1] : vector<128x128xf32> to vector<128xf32>
    %46 = vector.shape_cast %45 : vector<128xf32> to vector<128x1xf32>
    %47 = math.log %46 : vector<128x1xf32>
    %48 = arith.addf %47, %39 : vector<128x1xf32>
    %49 = vector.broadcast %48 : vector<128x1xf32> to vector<128x128xf32>
    %50 = arith.subf %32, %49 : vector<128x128xf32>
    %c0_35 = arith.constant 0 : index
    %c0_36 = arith.constant 0 : index
    %51 = vector.load %arg12[%c0_35, %c0_36] : memref<128x128xf32, #tpu.memory_space<vmem>>, vector<128x128xf32>
    tpu.vector_store %arg12[%c0_35, %c0_36], %50 {strides = array<i32>} : memref<128x128xf32, #tpu.memory_space<vmem>>, vector<128x128xf32>,
    return
  }
  func.func @transform_0(%arg0: i32) -> (i32, i32) {
    %c0_i32 = arith.constant 0 : i32
    %c0_i32_0 = arith.constant 0 : i32
    %c0_i32_1 = arith.constant 0 : i32
    return %c0_i32, %c0_i32_0 : i32, i32
  }
  func.func @transform_1(%arg0: i32) -> (i32, i32) {
    %c0_i32 = arith.constant 0 : i32
    %c0_i32_0 = arith.constant 0 : i32
    %c0_i32_1 = arith.constant 0 : i32
    return %c0_i32, %c0_i32_0 : i32, i32
  }
  func.func @transform_2(%arg0: i32) -> (i32, i32) {
    %c0_i32 = arith.constant 0 : i32
    %c0_i32_0 = arith.constant 0 : i32
    %c0_i32_1 = arith.constant 0 : i32
    return %c0_i32, %c0_i32_0 : i32, i32
  }
  func.func @transform_3(%arg0: i32) -> (i32, i32) {
    %c0_i32 = arith.constant 0 : i32
    %c0_i32_0 = arith.constant 0 : i32
    %c0_i32_1 = arith.constant 0 : i32
    return %c0_i32, %c0_i32_0 : i32, i32
  }
  func.func @transform_4(%arg0: i32) -> (i32, i32) {
    %c0_i32 = arith.constant 0 : i32
    %c0_i32_0 = arith.constant 0 : i32
    %c0_i32_1 = arith.constant 0 : i32
    return %c0_i32, %c0_i32_0 : i32, i32
  }
  func.func @transform_5(%arg0: i32) -> (i32, i32) {
    %c0_i32 = arith.constant 0 : i32
    %c0_i32_0 = arith.constant 0 : i32
    %c0_i32_1 = arith.constant 0 : i32
    return %c0_i32, %c0_i32_0 : i32, i32
  }
  func.func @transform_6(%arg0: i32) -> (i32, i32) {
    %c0_i32 = arith.constant 0 : i32
    %c0_i32_0 = arith.constant 0 : i32
    %c0_i32_1 = arith.constant 0 : i32
    return %c0_i32, %c0_i32_0 : i32, i32
  }
  func.func @transform_7(%arg0: i32) -> (i32, i32) {
    %c0_i32 = arith.constant 0 : i32
    %c0_i32_0 = arith.constant 0 : i32
    %c0_i32_1 = arith.constant 0 : i32
    return %c0_i32, %c0_i32_0 : i32, i32
  }
  func.func @transform_8(%arg0: i32) -> (i32, i32) {
    %c0_i32 = arith.constant 0 : i32
    %c0_i32_0 = arith.constant 0 : i32
    %c0_i32_1 = arith.constant 0 : i32
    return %c0_i32, %c0_i32_0 : i32, i32
  }
  func.func @transform_9(%arg0: i32) -> (i32, i32) {
    %c0_i32 = arith.constant 0 : i32
    %c0_i32_0 = arith.constant 0 : i32
    %c0_i32_1 = arith.constant 0 : i32
    return %c0_i32, %c0_i32_0 : i32, i32
  }
  func.func @transform_10(%arg0: i32) -> (i32, i32) {
    %c0_i32 = arith.constant 0 : i32
    %c0_i32_0 = arith.constant 0 : i32
    %c0_i32_1 = arith.constant 0 : i32
    return %c0_i32, %c0_i32_0 : i32, i32
  }
  func.func @transform_11(%arg0: i32) -> (i32, i32) {
    %c0_i32 = arith.constant 0 : i32
    %c0_i32_0 = arith.constant 0 : i32
    %c0_i32_1 = arith.constant 0 : i32
    return %c0_i32, %c0_i32_0 : i32, i32
  }
}

</mosaic_0001>

<bundles_post_ra>
// kernel: fused_forward.1
= control target key start
LH: loop header
LB: loop body
LE: loop exit
PB: predicated region body
PF: predicated region fallthrough
CT: control target
= control target key end

     0   :  { %s4226_s2 = inlined_call_operand.vmem [shape: f32[128,128], index: 2, kind: input, shape index: {}]   ;;  %s4227_s0 = inlined_call_operand.vmem [shape: f32[128,128], index: 0, kind: input, shape index: {}]   ;;  %s4228_s1 = inlined_call_operand.vmem [shape: f32[128,128], index: 1, kind: input, shape index: {}]   ;;  %s4229_s3 = inlined_call_operand.vmem [shape: f32[128,128], index: 3, kind: input, shape index: {}]   ;;  %s4230_s8 = inlined_call_operand.vmem [shape: f32[128,128], index: 8, kind: input, shape index: {}]   ;;  %s4231_s5 = inlined_call_operand.vmem [shape: f32[1,128], index: 5, kind: input, shape index: {}]   ;;  %s4232_s4 = inlined_call_operand.vmem [shape: f32[128,128], index: 4, kind: input, shape index: {}]   ;;  %s4233_s9 = inlined_call_operand.vmem [shape: f32[128,128], index: 9, kind: input, shape index: {}]   ;;  %s4234_s10 = inlined_call_operand.vmem [shape: f32[128,128], index: 10, kind: input, shape index: {}]   ;;  %s4235_s6 = inlined_call_operand.vmem [shape: f32[1,128], index: 6, kind: input, shape index: {}]   ;;  %s4236_s7 = inlined_call_operand.vmem [shape: f32[1,128], index: 7, kind: input, shape index: {}]   ;;  %s4237_s11 = inlined_call_operand.vmem [shape: f32[128,128], index: 11, kind: output, shape index: {}]  }
   0x1   :  { %v70_v0 = vld [vmem:[%s4226_s2] sm:$0xff]  ;;  %v71_v1 = vld [vmem:[%s4226_s2 + $0x8] sm:$0xff]  ;;  %v72_v2 = vld [vmem:[%s4226_s2 + $0x10] sm:$0xff] }
   0x2   :  { %v2598_v3 = vpack.c.bf16 %v71_v1, %v70_v0  ;;  %v73_v4 = vld [vmem:[%s4226_s2 + $0x18] sm:$0xff]  ;;  %v74_v6 = vld [vmem:[%s4226_s2 + $0x20] sm:$0xff]  ;;  %v75_v7 = vld [vmem:[%s4226_s2 + $0x28] sm:$0xff] }
   0x3   :  { %v2602_v5 = vpack.c.bf16 %v73_v4, %v72_v2  ;;  %v2606_v8 = vpack.c.bf16 %v75_v7, %v74_v6  ;;  %v3143_v9 = vld [vmem:[%s4227_s0] sm:$0xff]  ;;  %v76_v10 = vld [vmem:[%s4226_s2 + $0x30] sm:$0xff]  ;;  %v77_v11 = vld [vmem:[%s4226_s2 + $0x38] sm:$0xff] }
   0x4   :  { %2599 = vmatprep.subr.bf16.mxu0 %v2598_v3  ;;  %2126 = vmatprep.mubr.f32.mxu0 %v3143_v9  ;;  %v2610_v12 = vpack.c.bf16 %v77_v11, %v76_v10  ;;  %v78_v13 = vld [vmem:[%s4226_s2 + $0x40] sm:$0xff]  ;;  %v79_v14 = vld [vmem:[%s4226_s2 + $0x48] sm:$0xff]  ;;  %v80_v16 = vld [vmem:[%s4226_s2 + $0x50] sm:$0xff] }
   0x5   :  { %2601 = vmatpush3.bf16.msra.mxu0 %v2598_v3  ;;  %v2614_v15 = vpack.c.bf16 %v79_v14, %v78_v13  ;;  %v81_v17 = vld [vmem:[%s4226_s2 + $0x58] sm:$0xff]  ;;  %v82_v19 = vld [vmem:[%s4226_s2 + $0x60] sm:$0xff]  ;;  %v83_v20 = vld [vmem:[%s4226_s2 + $0x68] sm:$0xff] }
   0x6   :  { %2603 = vmatprep.subr.bf16.mxu0 %v2602_v5  ;;  %v2618_v18 = vpack.c.bf16 %v81_v17, %v80_v16  ;;  %v2622_v21 = vpack.c.bf16 %v83_v20, %v82_v19  ;;  %v84_v22 = vld [vmem:[%s4226_s2 + $0x70] sm:$0xff]  ;;  %v85_v23 = vld [vmem:[%s4226_s2 + $0x78] sm:$0xff]  ;;  %v3179_v25 = vld [vmem:[%s4227_s0 + $0x8] sm:$0xff] }
   0x7   :  { %v2626_v24 = vpack.c.bf16 %v85_v23, %v84_v22  ;;  %v3184_v26 = vld [vmem:[%s4227_s0 + $0x10] sm:$0xff]  ;;  %v3191_v27 = vld [vmem:[%s4227_s0 + $0x18] sm:$0xff]  ;;  %v3196_v28 = vld [vmem:[%s4227_s0 + $0x20] sm:$0xff] }
   0x8   :  { %v3203_v29 = vld [vmem:[%s4227_s0 + $0x28] sm:$0xff]  ;;  %v3208_v30 = vld [vmem:[%s4227_s0 + $0x30] sm:$0xff]  ;;  %v3215_v31 = vld [vmem:[%s4227_s0 + $0x38] sm:$0xff] }
   0x9   :  { %2605 = vmatpush3.bf16.msra.mxu0 %v2602_v5  ;;  %v3220_v32 = vld [vmem:[%s4227_s0 + $0x40] sm:$0xff]  ;;  %v3227_v33 = vld [vmem:[%s4227_s0 + $0x48] sm:$0xff]  ;;  %v3232_v34 = vld [vmem:[%s4227_s0 + $0x50] sm:$0xff] }
   0xa   :  { %2607 = vmatprep.subr.bf16.mxu0 %v2606_v8  ;;  %v3239_v35 = vld [vmem:[%s4227_s0 + $0x58] sm:$0xff]  ;;  %v3244_v36 = vld [vmem:[%s4227_s0 + $0x60] sm:$0xff]  ;;  %v3251_v37 = vld [vmem:[%s4227_s0 + $0x68] sm:$0xff] }
   0xb   :  { %v3256_v38 = vld [vmem:[%s4227_s0 + $0x70] sm:$0xff]  ;;  %v3263_v39 = vld [vmem:[%s4227_s0 + $0x78] sm:$0xff]  ;;  %v3269_v40 = vld [vmem:[%s4228_s1] sm:$0xff] }
   0xc   :  { %2182 = vmatprep.mubr.f32.mxu1 %v3269_v40  ;;  %v576_v41 = vld [vmem:[%s4229_s3] sm:$0xff]  ;;  %v577_v42 = vld [vmem:[%s4229_s3 + $0x8] sm:$0xff]  ;;  %v578_v43 = vld [vmem:[%s4229_s3 + $0x10] sm:$0xff] }
   0xd   :  { %2609 = vmatpush3.bf16.msra.mxu0 %v2606_v8  ;;  %v2694_v44 = vpack.c.bf16 %v577_v42, %v576_v41  ;;  %v579_v45 = vld [vmem:[%s4229_s3 + $0x18] sm:$0xff]  ;;  %v580_v47 = vld [vmem:[%s4229_s3 + $0x20] sm:$0xff]  ;;  %v581_v48 = vld [vmem:[%s4229_s3 + $0x28] sm:$0xff] }
   0xe   :  { %2611 = vmatprep.subr.bf16.mxu0 %v2610_v12  ;;  %v2698_v46 = vpack.c.bf16 %v579_v45, %v578_v43  ;;  %v2702_v49 = vpack.c.bf16 %v581_v48, %v580_v47  ;;  %v582_v50 = vld [vmem:[%s4229_s3 + $0x30] sm:$0xff]  ;;  %v583_v51 = vld [vmem:[%s4229_s3 + $0x38] sm:$0xff]  ;;  %v584_v53 = vld [vmem:[%s4229_s3 + $0x40] sm:$0xff] }
   0xf   :  { %v2706_v52 = vpack.c.bf16 %v583_v51, %v582_v50  ;;  %v585_v54 = vld [vmem:[%s4229_s3 + $0x48] sm:$0xff]  ;;  %v586_v56 = vld [vmem:[%s4229_s3 + $0x50] sm:$0xff]  ;;  %v587_v57 = vld [vmem:[%s4229_s3 + $0x58] sm:$0xff] }
  0x10   :  { %v2710_v55 = vpack.c.bf16 %v585_v54, %v584_v53  ;;  %v2714_v58 = vpack.c.bf16 %v587_v57, %v586_v56  ;;  %v588_v59 = vld [vmem:[%s4229_s3 + $0x60] sm:$0xff]  ;;  %v589_v60 = vld [vmem:[%s4229_s3 + $0x68] sm:$0xff]  ;;  %v385_v42 = vld [vmem:[%s4230_s8 + $0x10] sm:$0xff] }
  0x11   :  { %2613 = vmatpush3.bf16.msra.mxu0 %v2610_v12  ;;  %v2718_v61 = vpack.c.bf16 %v589_v60, %v588_v59  ;;  %v383_v20 = vld [vmem:[%s4230_s8] sm:$0xff]  ;;  %v386_v43 = vld [vmem:[%s4230_s8 + $0x18] sm:$0xff]  ;;  %v3334_v45 = vld [vmem:[%s4228_s1 + $0x10] sm:$0xff] }
  0x12   :  { %2615 = vmatprep.subr.bf16.mxu0 %v2614_v15  ;;  %v387_v47 = vld [vmem:[%s4230_s8 + $0x20] sm:$0xff]  ;;  %v388_v48 = vld [vmem:[%s4230_s8 + $0x28] sm:$0xff]  ;;  %v390_v53 = vld [vmem:[%s4230_s8 + $0x38] sm:$0xff] }
  0x13   :  { %v3352_v50 = vld [vmem:[%s4228_s1 + $0x20] sm:$0xff]  ;;  %v2670_v51 = vpack.c.bf16 %v388_v48, %v387_v47  ;;  %v3365_v54 = vld [vmem:[%s4228_s1 + $0x28] sm:$0xff]  ;;  %v3383_v59 = vld [vmem:[%s4228_s1 + $0x38] sm:$0xff] }
  0x14   :  { %v391_v57 = vld [vmem:[%s4230_s8 + $0x40] sm:$0xff] }
  0x15   :  { %2617 = vmatpush3.bf16.msra.mxu0 %v2614_v15  ;;  %v3388_v60 = vld [vmem:[%s4228_s1 + $0x40] sm:$0xff] }
  0x16   :  { %2619 = vmatprep.subr.bf16.mxu0 %v2618_v18 }
  0x19   :  { %2621 = vmatpush3.bf16.msra.mxu0 %v2618_v18 }
  0x1a   :  { %2623 = vmatprep.subr.bf16.mxu0 %v2622_v21 }
  0x1d   :  { %2625 = vmatpush3.bf16.msra.mxu0 %v2622_v21  ;;  %v384_v21 = vld [vmem:[%s4230_s8 + $0x8] sm:$0xff] }
  0x1e   :  { %2627 = vmatprep.subr.bf16.mxu0 %v2626_v24  ;;  %v2662_v41 = vpack.c.bf16 %v384_v21, %v383_v20 }
  0x21   :  { %2629 = vmatpush3.bf16.msra.mxu0 %v2626_v24 }
  0x22   :  { %2695 = vmatprep.subr.bf16.mxu0 %v2694_v44 }
  0x24   :  { %2127 = vmatmul.mubr.f32.vlgmr.msra.gmra.mrb[0].mxu0 %v3179_v25 }
  0x25   :  { %2129 = vmatprep.mubr.f32.mxu0 %v3184_v26  ;;  %2697 = vmatpush3.bf16.msra.mxu0 %v2694_v44  ;;  %v3329_v44 = vld [vmem:[%s4228_s1 + $0x8] sm:$0xff] }
  0x26   :  { %2699 = vmatprep.subr.bf16.mxu0 %v2698_v46 }
  0x28   :  { %2130 = vmatmul.mubr.f32.gmra.mrb[2].mxu0 %v3191_v27 }
  0x29   :  { %2132 = vmatprep.mubr.f32.mxu0 %v3196_v28  ;;  %2701 = vmatpush3.bf16.msra.mxu0 %v2698_v46  ;;  %v2666_v46 = vpack.c.bf16 %v386_v43, %v385_v42 }
  0x2a   :  { %2703 = vmatprep.subr.bf16.mxu0 %v2702_v49 }
  0x2c   :  { %2133 = vmatmul.mubr.f32.gmra.mrb[4].mxu0 %v3203_v29 }
  0x2d   :  { %2135 = vmatprep.mubr.f32.mxu0 %v3208_v30  ;;  %2705 = vmatpush3.bf16.msra.mxu0 %v2702_v49  ;;  %v3347_v49 = vld [vmem:[%s4228_s1 + $0x18] sm:$0xff] }
  0x2e   :  { %2707 = vmatprep.subr.bf16.mxu0 %v2706_v52 }
  0x30   :  { %2136 = vmatmul.mubr.f32.gmra.mrb[6].mxu0 %v3215_v31 }
  0x31   :  { %2138 = vmatprep.mubr.f32.mxu0 %v3220_v32  ;;  %2709 = vmatpush3.bf16.msra.mxu0 %v2706_v52  ;;  %v389_v52 = vld [vmem:[%s4230_s8 + $0x30] sm:$0xff] }
  0x32   :  { %2711 = vmatprep.subr.bf16.mxu0 %v2710_v55  ;;  %v2674_v56 = vpack.c.bf16 %v390_v53, %v389_v52 }
  0x34   :  { %2139 = vmatmul.mubr.f32.gmra.mrb[8].mxu0 %v3227_v33 }
  0x35   :  { %2141 = vmatprep.mubr.f32.mxu0 %v3232_v34  ;;  %2713 = vmatpush3.bf16.msra.mxu0 %v2710_v55  ;;  %v3370_v55 = vld [vmem:[%s4228_s1 + $0x30] sm:$0xff] }
  0x36   :  { %2715 = vmatprep.subr.bf16.mxu0 %v2714_v58 }
  0x38   :  { %2142 = vmatmul.mubr.f32.gmra.mrb[10].mxu0 %v3239_v35 }
  0x39   :  { %2144 = vmatprep.mubr.f32.mxu0 %v3244_v36  ;;  %2717 = vmatpush3.bf16.msra.mxu0 %v2714_v58  ;;  %v392_v58 = vld [vmem:[%s4230_s8 + $0x48] sm:$0xff] }
  0x3a   :  { %2719 = vmatprep.subr.bf16.mxu0 %v2718_v61 }
  0x3c   :  { %2145 = vmatmul.mubr.f32.gmra.mrb[12].mxu0 %v3251_v37 }
  0x3d   :  { %2147 = vmatprep.mubr.f32.mxu0 %v3256_v38  ;;  %2721 = vmatpush3.bf16.msra.mxu0 %v2718_v61  ;;  %v2678_v61 = vpack.c.bf16 %v392_v58, %v391_v57 }
  0x40   :  { %2148 = vmatmul.mubr.f32.gmra.mrb[14].mxu0 %v3263_v39 }
  0xf7   :  { %v2128_v62 = vpop.f32.mrb[0].mxu0 }
  0xf8   :  { %v152_v63 = vpop.f32.mrb[1].mxu0 }
  0xf9   :  { %v2630_v0 = vpack.c.bf16 %v2128_v62, %v152_v63  ;;  %v393_v62 = vld [vmem:[%s4230_s8 + $0x50] sm:$0xff]  ;;  %v394_v63 = vld [vmem:[%s4230_s8 + $0x58] sm:$0xff] }
  0xfb   :  { %v2131_v1 = vpop.f32.mrb[2].mxu0  ;;  %2631 = vmatprep.subr.bf16.mxu1 %v2630_v0 }
  0xfc   :  { %v162_v2 = vpop.f32.mrb[3].mxu0  ;;  %2633 = vmatpush3.bf16.msra.mxu1 %v2630_v0  ;;  %v3401_v0 = vld [vmem:[%s4228_s1 + $0x48] sm:$0xff] }
  0xfd   :  { %v2634_v3 = vpack.c.bf16 %v2131_v1, %v162_v2  ;;  %v3406_v1 = vld [vmem:[%s4228_s1 + $0x50] sm:$0xff]  ;;  %v2682_v2 = vpack.c.bf16 %v394_v63, %v393_v62 }
  0xff   :  { %v2134_v4 = vpop.f32.mrb[4].mxu0  ;;  %2635 = vmatprep.subr.bf16.mxu1 %v2634_v3 }
 0x100   :  { %v172_v5 = vpop.f32.mrb[5].mxu0  ;;  %2637 = vmatpush3.bf16.msra.mxu1 %v2634_v3  ;;  %v395_v3 = vld [vmem:[%s4230_s8 + $0x60] sm:$0xff] }
 0x101   :  { %v2638_v6 = vpack.c.bf16 %v2134_v4, %v172_v5  ;;  %v396_v4 = vld [vmem:[%s4230_s8 + $0x68] sm:$0xff]  ;;  %v3419_v5 = vld [vmem:[%s4228_s1 + $0x58] sm:$0xff] }
 0x103   :  { %v2137_v7 = vpop.f32.mrb[6].mxu0  ;;  %2639 = vmatprep.subr.bf16.mxu1 %v2638_v6 }
 0x104   :  { %v182_v8 = vpop.f32.mrb[7].mxu0  ;;  %2641 = vmatpush3.bf16.msra.mxu1 %v2638_v6  ;;  %v3424_v6 = vld [vmem:[%s4228_s1 + $0x60] sm:$0xff] }
 0x105   :  { %v2642_v10 = vpack.c.bf16 %v2137_v7, %v182_v8  ;;  %v2686_v7 = vpack.c.bf16 %v396_v4, %v395_v3  ;;  %v397_v8 = vld [vmem:[%s4230_s8 + $0x70] sm:$0xff] }
 0x107   :  { %v2140_v11 = vpop.f32.mrb[8].mxu0  ;;  %2643 = vmatprep.subr.bf16.mxu1 %v2642_v10 }
 0x108   :  { %v192_v12 = vpop.f32.mrb[9].mxu0  ;;  %2645 = vmatpush3.bf16.msra.mxu1 %v2642_v10  ;;  %v398_v10 = vld [vmem:[%s4230_s8 + $0x78] sm:$0xff] }
 0x109   :  { %v2646_v13 = vpack.c.bf16 %v2140_v11, %v192_v12  ;;  %v3437_v11 = vld [vmem:[%s4228_s1 + $0x68] sm:$0xff]  ;;  %v3442_v12 = vld [vmem:[%s4228_s1 + $0x70] sm:$0xff] }
 0x10b   :  { %v2143_v14 = vpop.f32.mrb[10].mxu0  ;;  %2647 = vmatprep.subr.bf16.mxu1 %v2646_v13 }
 0x10c   :  { %v202_v15 = vpop.f32.mrb[11].mxu0  ;;  %2649 = vmatpush3.bf16.msra.mxu1 %v2646_v13  ;;  %v2690_v13 = vpack.c.bf16 %v398_v10, %v397_v8 }
 0x10d   :  { %v2650_v16 = vpack.c.bf16 %v2143_v14, %v202_v15  ;;  %v3449_v14 = vld [vmem:[%s4228_s1 + $0x78] sm:$0xff] }
 0x10f   :  { %v2146_v17 = vpop.f32.mrb[12].mxu0  ;;  %2651 = vmatprep.subr.bf16.mxu1 %v2650_v16 }
 0x110   :  { %v212_v18 = vpop.f32.mrb[13].mxu0  ;;  %2653 = vmatpush3.bf16.msra.mxu1 %v2650_v16 }
 0x111   :  { %v2654_v19 = vpack.c.bf16 %v2146_v17, %v212_v18 }
 0x113   :  { %v2149_v22 = vpop.f32.mrb[14].mxu0  ;;  %2655 = vmatprep.subr.bf16.mxu1 %v2654_v19 }
 0x114   :  { %v222_v23 = vpop.f32.mrb[15].mxu0  ;;  %2657 = vmatpush3.bf16.msra.mxu1 %v2654_v19 }
 0x115   :  { %v2658_v24 = vpack.c.bf16 %v2149_v22, %v222_v23 }
 0x117   :  { %2659 = vmatprep.subr.bf16.mxu1 %v2658_v24 }
 0x118   :  { %2661 = vmatpush3.bf16.msra.mxu1 %v2658_v24 }
 0x119   :  { %2663 = vmatprep.subr.bf16.mxu1 %v2662_v41 }
 0x11b   :  { %2183 = vmatmul.mubr.f32.vlgmr.msra.gmra.mrb[0].mxu1 %v3329_v44 }
 0x11c   :  { %2665 = vmatpush3.bf16.msra.mxu1 %v2662_v41  ;;  %2185 = vmatprep.mubr.f32.mxu1 %v3334_v45 }
 0x11d   :  { %2667 = vmatprep.subr.bf16.mxu1 %v2666_v46 }
 0x11f   :  { %2186 = vmatmul.mubr.f32.gmra.mrb[2].mxu1 %v3347_v49 }
 0x120   :  { %2669 = vmatpush3.bf16.msra.mxu1 %v2666_v46  ;;  %2188 = vmatprep.mubr.f32.mxu1 %v3352_v50 }
 0x121   :  { %2671 = vmatprep.subr.bf16.mxu1 %v2670_v51 }
 0x123   :  { %2189 = vmatmul.mubr.f32.gmra.mrb[4].mxu1 %v3365_v54 }
 0x124   :  { %2673 = vmatpush3.bf16.msra.mxu1 %v2670_v51  ;;  %2191 = vmatprep.mubr.f32.mxu1 %v3370_v55 }
 0x125   :  { %2675 = vmatprep.subr.bf16.mxu1 %v2674_v56 }
 0x127   :  { %2192 = vmatmul.mubr.f32.gmra.mrb[6].mxu1 %v3383_v59 }
 0x128   :  { %2677 = vmatpush3.bf16.msra.mxu1 %v2674_v56  ;;  %2194 = vmatprep.mubr.f32.mxu1 %v3388_v60 }
 0x129   :  { %2679 = vmatprep.subr.bf16.mxu1 %v2678_v61 }
 0x12b   :  { %2195 = vmatmul.mubr.f32.gmra.mrb[8].mxu1 %v3401_v0 }
 0x12c   :  { %2681 = vmatpush3.bf16.msra.mxu1 %v2678_v61  ;;  %2197 = vmatprep.mubr.f32.mxu1 %v3406_v1 }
 0x12d   :  { %2683 = vmatprep.subr.bf16.mxu1 %v2682_v2 }
 0x12f   :  { %2198 = vmatmul.mubr.f32.gmra.mrb[10].mxu1 %v3419_v5 }
 0x130   :  { %2685 = vmatpush3.bf16.msra.mxu1 %v2682_v2  ;;  %2200 = vmatprep.mubr.f32.mxu1 %v3424_v6 }
 0x131   :  { %2687 = vmatprep.subr.bf16.mxu1 %v2686_v7 }
 0x133   :  { %2201 = vmatmul.mubr.f32.gmra.mrb[12].mxu1 %v3437_v11 }
 0x134   :  { %2689 = vmatpush3.bf16.msra.mxu1 %v2686_v7  ;;  %2203 = vmatprep.mubr.f32.mxu1 %v3442_v12 }
 0x135   :  { %2691 = vmatprep.subr.bf16.mxu1 %v2690_v13 }
 0x137   :  { %2204 = vmatmul.mubr.f32.gmra.mrb[14].mxu1 %v3449_v14 }
 0x138   :  { %2693 = vmatpush3.bf16.msra.mxu1 %v2690_v13  ;;  %2238 = vmatprep.mubr.f32.mxu1 %v3143_v9  ;;  %v590_v9 = vld [vmem:[%s4229_s3 + $0x70] sm:$0xff] }
 0x13b   :  { %2239 = vmatmul.mubr.f32.vlgmr.msra.gmra.mrb[0].mxu1 %v3179_v25  ;;  %v591_v25 = vld [vmem:[%s4229_s3 + $0x78] sm:$0xff] }
 0x13c   :  { %2241 = vmatprep.mubr.f32.mxu1 %v3184_v26  ;;  %v2722_v26 = vpack.c.bf16 %v591_v25, %v590_v9 }
 0x13e   :  { %2723 = vmatprep.subr.bf16.mxu0 %v2722_v26 }
 0x13f   :  { %2242 = vmatmul.mubr.f32.gmra.mrb[2].mxu1 %v3191_v27  ;;  %2725 = vmatpush3.bf16.msra.mxu0 %v2722_v26  ;;  %v1803_v27 = vld [vmem:[%s4231_s5] ss:$0 sm:$0xff] }
 0x140   :  { %2244 = vmatprep.mubr.f32.mxu1 %v3196_v28 }
 0x143   :  { %2245 = vmatmul.mubr.f32.gmra.mrb[4].mxu1 %v3203_v29 }
 0x144   :  { %2247 = vmatprep.mubr.f32.mxu1 %v3208_v30 }
 0x147   :  { %2248 = vmatmul.mubr.f32.gmra.mrb[6].mxu1 %v3215_v31 }
 0x148   :  { %2250 = vmatprep.mubr.f32.mxu1 %v3220_v32 }
 0x14b   :  { %2251 = vmatmul.mubr.f32.gmra.mrb[8].mxu1 %v3227_v33 }
 0x14c   :  { %2253 = vmatprep.mubr.f32.mxu1 %v3232_v34 }
 0x14f   :  { %2254 = vmatmul.mubr.f32.gmra.mrb[10].mxu1 %v3239_v35 }
 0x150   :  { %2256 = vmatprep.mubr.f32.mxu1 %v3244_v36 }
 0x153   :  { %2257 = vmatmul.mubr.f32.gmra.mrb[12].mxu1 %v3251_v37 }
 0x154   :  { %2259 = vmatprep.mubr.f32.mxu1 %v3256_v38 }
 0x157   :  { %2260 = vmatmul.mubr.f32.gmra.mrb[14].mxu1 %v3263_v39 }
 0x20e   :  { %v2240_v28 = vpop.f32.mrb[0].mxu1 }
 0x20f   :  { %v3477_v29 = vadd.f32 %v2240_v28, %v1803_v27  ;;  %v465_v30 = vpop.f32.mrb[1].mxu1 }
 0x210   :  { %v3479_v31 = vadd.f32 %v1803_v27, %v465_v30  ;;  %v1083_v30 = vld [vmem:[%s4232_s4 + $0x8] sm:$0xff] }
 0x211   :  { %v561_v34 = vmax.f32 %v3477_v29, 0.0 }
 0x212   :  { %v560_v32 = vmax.f32 %v3479_v31, 0.0  ;;  %v2243_v33 = vpop.f32.mrb[2].mxu1 }
 0x213   :  { %v3483_v35 = vadd.f32 %v2243_v33, %v1803_v27  ;;  %v475_v36 = vpop.f32.mrb[3].mxu1 }
 0x214   :  { %v3485_v37 = vadd.f32 %v1803_v27, %v475_v36  ;;  %2294 = vmatprep.mubr.f32.mxu0 %v560_v32  ;;  %v1084_v36 = vld [vmem:[%s4232_s4 + $0x10] sm:$0xff] }
 0x215   :  { %2295 = vmatmul.mubr.f32.vlgmr.msra.gmra.mrb[16].mxu0 %v561_v34  ;;  %v563_v15 = vmax.f32 %v3483_v35, 0.0 }
 0x216   :  { %v562_v38 = vmax.f32 %v3485_v37, 0.0  ;;  %v2246_v39 = vpop.f32.mrb[4].mxu1  ;;  %v1404_v37 = vld [vmem:[%s4234_s10 + $0x48] sm:$0xff] }
 0x217   :  { %v3493_v16 = vadd.f32 %v2246_v39, %v1803_v27  ;;  %v485_v17 = vpop.f32.mrb[5].mxu1  ;;  %v1085_v39 = vld [vmem:[%s4232_s4 + $0x18] sm:$0xff] }
 0x218   :  { %v3495_v18 = vadd.f32 %v1803_v27, %v485_v17  ;;  %2297 = vmatprep.mubr.f32.mxu0 %v562_v38  ;;  %v2794_v17 = vpack.c.bf16 %v1085_v39, %v1084_v36  ;;  %v1095_v36 = vld [vmem:[%s4232_s4 + $0x68] sm:$0xff] }
 0x219   :  { %2298 = vmatmul.mubr.f32.gmra.mrb[18].mxu0 %v563_v15  ;;  %v565_v21 = vmax.f32 %v3493_v16, 0.0 }
 0x21a   :  { %v564_v19 = vmax.f32 %v3495_v18, 0.0  ;;  %v2249_v20 = vpop.f32.mrb[6].mxu1  ;;  %v1407_v18 = vld [vmem:[%s4234_s10 + $0x60] sm:$0xff] }
 0x21b   :  { %v3503_v22 = vadd.f32 %v2249_v20, %v1803_v27  ;;  %v495_v23 = vpop.f32.mrb[7].mxu1  ;;  %v1086_v20 = vld [vmem:[%s4232_s4 + $0x20] sm:$0xff] }
 0x21c   :  { %v3505_v24 = vadd.f32 %v1803_v27, %v495_v23  ;;  %2300 = vmatprep.mubr.f32.mxu0 %v564_v19  ;;  %v1087_v23 = vld [vmem:[%s4232_s4 + $0x28] sm:$0xff] }
 0x21d   :  { %2301 = vmatmul.mubr.f32.gmra.mrb[20].mxu0 %v565_v21  ;;  %v567_v43 = vmax.f32 %v3503_v22, 0.0  ;;  %v1096_v22 = vld [vmem:[%s4232_s4 + $0x70] sm:$0xff] }
 0x21e   :  { %v566_v41 = vmax.f32 %v3505_v24, 0.0  ;;  %v2252_v42 = vpop.f32.mrb[8].mxu1  ;;  %v1097_v24 = vld [vmem:[%s4232_s4 + $0x78] sm:$0xff] }
 0x21f   :  { %v3513_v46 = vadd.f32 %v2252_v42, %v1803_v27  ;;  %v505_v47 = vpop.f32.mrb[9].mxu1  ;;  %v2798_v42 = vpack.c.bf16 %v1087_v23, %v1086_v20 }
 0x220   :  { %v3515_v48 = vadd.f32 %v1803_v27, %v505_v47  ;;  %2303 = vmatprep.mubr.f32.mxu0 %v566_v41  ;;  %v1088_v47 = vld [vmem:[%s4232_s4 + $0x30] sm:$0xff] }
 0x221   :  { %2304 = vmatmul.mubr.f32.gmra.mrb[22].mxu0 %v567_v43  ;;  %v569_v53 = vmax.f32 %v3513_v46, 0.0  ;;  %v1410_v46 = vld [vmem:[%s4234_s10 + $0x78] sm:$0xff] }
 0x222   :  { %v568_v51 = vmax.f32 %v3515_v48, 0.0  ;;  %v2255_v52 = vpop.f32.mrb[10].mxu1 }
 0x223   :  { %v3523_v56 = vadd.f32 %v2255_v52, %v1803_v27  ;;  %v515_v57 = vpop.f32.mrb[11].mxu1  ;;  %v1089_v52 = vld [vmem:[%s4232_s4 + $0x38] sm:$0xff] }
 0x224   :  { %v3525_v58 = vadd.f32 %v1803_v27, %v515_v57  ;;  %2306 = vmatprep.mubr.f32.mxu0 %v568_v51  ;;  %v2802_v57 = vpack.c.bf16 %v1089_v52, %v1088_v47 }
 0x225   :  { %2307 = vmatmul.mubr.f32.gmra.mrb[24].mxu0 %v569_v53  ;;  %v571_v63 = vmax.f32 %v3523_v56, 0.0 }
 0x226   :  { %v570_v61 = vmax.f32 %v3525_v58, 0.0  ;;  %v2258_v62 = vpop.f32.mrb[12].mxu1 }
 0x227   :  { %v3533_v2 = vadd.f32 %v2258_v62, %v1803_v27  ;;  %v525_v3 = vpop.f32.mrb[13].mxu1  ;;  %v1090_v62 = vld [vmem:[%s4232_s4 + $0x40] sm:$0xff] }
 0x228   :  { %v3535_v4 = vadd.f32 %v1803_v27, %v525_v3  ;;  %2309 = vmatprep.mubr.f32.mxu0 %v570_v61  ;;  %v1091_v3 = vld [vmem:[%s4232_s4 + $0x48] sm:$0xff] }
 0x229   :  { %2310 = vmatmul.mubr.f32.gmra.mrb[26].mxu0 %v571_v63  ;;  %v573_v10 = vmax.f32 %v3533_v2, 0.0 }
 0x22a   :  { %v572_v7 = vmax.f32 %v3535_v4, 0.0  ;;  %v2261_v8 = vpop.f32.mrb[14].mxu1 }
 0x22b   :  { %v3543_v13 = vadd.f32 %v2261_v8, %v1803_v27  ;;  %v535_v9 = vpop.f32.mrb[15].mxu1  ;;  %v2806_v8 = vpack.c.bf16 %v1091_v3, %v1090_v62 }
 0x22c   :  { %v3545_v25 = vadd.f32 %v1803_v27, %v535_v9  ;;  %2312 = vmatprep.mubr.f32.mxu0 %v572_v7  ;;  %v1082_v27 = vld [vmem:[%s4232_s4] sm:$0xff]  ;;  %v1092_v9 = vld [vmem:[%s4232_s4 + $0x50] sm:$0xff] }
 0x22d   :  { %2313 = vmatmul.mubr.f32.gmra.mrb[28].mxu0 %v573_v10  ;;  %v575_v28 = vmax.f32 %v3543_v13, 0.0  ;;  %v2790_v33 = vpack.c.bf16 %v1083_v30, %v1082_v27  ;;  %v1093_v27 = vld [vmem:[%s4232_s4 + $0x58] sm:$0xff] }
 0x22e   :  { %v574_v26 = vmax.f32 %v3545_v25, 0.0  ;;  %v2810_v30 = vpack.c.bf16 %v1093_v27, %v1092_v9 }
 0x22f   :  { %2791 = vmatprep.subr.bf16.mxu1 %v2790_v33 }
 0x230   :  { %2315 = vmatprep.mubr.f32.mxu0 %v574_v26  ;;  %2793 = vmatpush3.bf16.msra.mxu1 %v2790_v33  ;;  %v1094_v33 = vld [vmem:[%s4232_s4 + $0x60] sm:$0xff] }
 0x231   :  { %2316 = vmatmul.mubr.f32.gmra.mrb[30].mxu0 %v575_v28  ;;  %2795 = vmatprep.subr.bf16.mxu1 %v2794_v17  ;;  %v2814_v39 = vpack.c.bf16 %v1095_v36, %v1094_v33 }
 0x232   :  { %2350 = vmatprep.mubr.f32.mxu0 %v3269_v40 }
 0x234   :  { %2797 = vmatpush3.bf16.msra.mxu1 %v2794_v17 }
 0x235   :  { %2799 = vmatprep.subr.bf16.mxu1 %v2798_v42 }
 0x238   :  { %2801 = vmatpush3.bf16.msra.mxu1 %v2798_v42 }
 0x239   :  { %2803 = vmatprep.subr.bf16.mxu1 %v2802_v57 }
 0x23c   :  { %2805 = vmatpush3.bf16.msra.mxu1 %v2802_v57 }
 0x23d   :  { %2807 = vmatprep.subr.bf16.mxu1 %v2806_v8 }
 0x240   :  { %2809 = vmatpush3.bf16.msra.mxu1 %v2806_v8 }
 0x241   :  { %2811 = vmatprep.subr.bf16.mxu1 %v2810_v30 }
 0x244   :  { %2813 = vmatpush3.bf16.msra.mxu1 %v2810_v30 }
 0x245   :  { %2815 = vmatprep.subr.bf16.mxu1 %v2814_v39 }
 0x248   :  { %2817 = vmatpush3.bf16.msra.mxu1 %v2814_v39 }
 0x2e8   :  { %v2296_v17 = vpop.f32.mrb[16].mxu0 }
 0x2e9   :  { %v658_v20 = vpop.f32.mrb[17].mxu0 }
 0x2ea   :  { %v2726_v23 = vpack.c.bf16 %v2296_v17, %v658_v20 }
 0x2ec   :  { %v2299_v42 = vpop.f32.mrb[18].mxu0  ;;  %2727 = vmatprep.subr.bf16.mxu0 %v2726_v23 }
 0x2ed   :  { %v668_v47 = vpop.f32.mrb[19].mxu0  ;;  %2729 = vmatpush3.bf16.msra.mxu0 %v2726_v23 }
 0x2ee   :  { %v2730_v52 = vpack.c.bf16 %v2299_v42, %v668_v47 }
 0x2f0   :  { %v2302_v57 = vpop.f32.mrb[20].mxu0  ;;  %2731 = vmatprep.subr.bf16.mxu0 %v2730_v52 }
 0x2f1   :  { %v678_v62 = vpop.f32.mrb[21].mxu0  ;;  %2733 = vmatpush3.bf16.msra.mxu0 %v2730_v52  ;;  %v889_v52 = vld [vmem:[%s4233_s9] sm:$0xff] }
 0x2f2   :  { %v2734_v3 = vpack.c.bf16 %v2302_v57, %v678_v62  ;;  %v890_v57 = vld [vmem:[%s4233_s9 + $0x8] sm:$0xff] }
 0x2f4   :  { %v2305_v9 = vpop.f32.mrb[22].mxu0  ;;  %2735 = vmatprep.subr.bf16.mxu0 %v2734_v3 }
 0x2f5   :  { %v688_v8 = vpop.f32.mrb[23].mxu0  ;;  %2737 = vmatpush3.bf16.msra.mxu0 %v2734_v3 }
 0x2f6   :  { %v2738_v27 = vpack.c.bf16 %v2305_v9, %v688_v8  ;;  %v2758_v8 = vpack.c.bf16 %v890_v57, %v889_v52  ;;  %v898_v52 = vld [vmem:[%s4233_s9 + $0x48] sm:$0xff] }
 0x2f8   :  { %v2308_v30 = vpop.f32.mrb[24].mxu0  ;;  %2739 = vmatprep.subr.bf16.mxu0 %v2738_v27 }
 0x2f9   :  { %v698_v33 = vpop.f32.mrb[25].mxu0  ;;  %2741 = vmatpush3.bf16.msra.mxu0 %v2738_v27  ;;  %v891_v27 = vld [vmem:[%s4233_s9 + $0x10] sm:$0xff] }
 0x2fa   :  { %v2742_v36 = vpack.c.bf16 %v2308_v30, %v698_v33  ;;  %v892_v30 = vld [vmem:[%s4233_s9 + $0x18] sm:$0xff] }
 0x2fb   :  { %v2762_v33 = vpack.c.bf16 %v892_v30, %v891_v27  ;;  %v902_v27 = vld [vmem:[%s4233_s9 + $0x68] sm:$0xff] }
 0x2fc   :  { %v2311_v39 = vpop.f32.mrb[26].mxu0  ;;  %2743 = vmatprep.subr.bf16.mxu0 %v2742_v36 }
 0x2fd   :  { %v708_v17 = vpop.f32.mrb[27].mxu0  ;;  %2745 = vmatpush3.bf16.msra.mxu0 %v2742_v36  ;;  %v893_v36 = vld [vmem:[%s4233_s9 + $0x20] sm:$0xff] }
 0x2fe   :  { %v2746_v20 = vpack.c.bf16 %v2311_v39, %v708_v17  ;;  %v894_v39 = vld [vmem:[%s4233_s9 + $0x28] sm:$0xff] }
 0x2ff   :  { %v2766_v17 = vpack.c.bf16 %v894_v39, %v893_v36  ;;  %v904_v36 = vld [vmem:[%s4233_s9 + $0x78] sm:$0xff] }
 0x300   :  { %v2314_v23 = vpop.f32.mrb[28].mxu0  ;;  %2747 = vmatprep.subr.bf16.mxu0 %v2746_v20 }
 0x301   :  { %v718_v42 = vpop.f32.mrb[29].mxu0  ;;  %2749 = vmatpush3.bf16.msra.mxu0 %v2746_v20  ;;  %v895_v20 = vld [vmem:[%s4233_s9 + $0x30] sm:$0xff] }
 0x302   :  { %v2750_v47 = vpack.c.bf16 %v2314_v23, %v718_v42  ;;  %v896_v23 = vld [vmem:[%s4233_s9 + $0x38] sm:$0xff] }
 0x303   :  { %v2770_v42 = vpack.c.bf16 %v896_v23, %v895_v20  ;;  %v1396_v20 = vld [vmem:[%s4234_s10 + $0x8] sm:$0xff] }
 0x304   :  { %v2317_v62 = vpop.f32.mrb[30].mxu0  ;;  %2751 = vmatprep.subr.bf16.mxu0 %v2750_v47 }
 0x305   :  { %v728_v3 = vpop.f32.mrb[31].mxu0  ;;  %2753 = vmatpush3.bf16.msra.mxu0 %v2750_v47  ;;  %v897_v47 = vld [vmem:[%s4233_s9 + $0x40] sm:$0xff] }
 0x306   :  { %v2754_v9 = vpack.c.bf16 %v2317_v62, %v728_v3  ;;  %v2774_v57 = vpack.c.bf16 %v898_v52, %v897_v47  ;;  %v899_v62 = vld [vmem:[%s4233_s9 + $0x50] sm:$0xff]  ;;  %v900_v3 = vld [vmem:[%s4233_s9 + $0x58] sm:$0xff] }
 0x307   :  { %v1398_v47 = vld [vmem:[%s4234_s10 + $0x18] sm:$0xff] }
 0x308   :  { %2755 = vmatprep.subr.bf16.mxu0 %v2754_v9 }
 0x309   :  { %2757 = vmatpush3.bf16.msra.mxu0 %v2754_v9  ;;  %v2778_v9 = vpack.c.bf16 %v900_v3, %v899_v62  ;;  %v1400_v62 = vld [vmem:[%s4234_s10 + $0x28] sm:$0xff]  ;;  %v1402_v3 = vld [vmem:[%s4234_s10 + $0x38] sm:$0xff] }
 0x30a   :  { %2759 = vmatprep.subr.bf16.mxu0 %v2758_v8 }
 0x30c   :  { %2351 = vmatmul.mubr.f32.vlgmr.msra.gmra.mrb[32].mxu0 %v3329_v44 }
 0x30d   :  { %2761 = vmatpush3.bf16.msra.mxu0 %v2758_v8  ;;  %2353 = vmatprep.mubr.f32.mxu0 %v3334_v45  ;;  %v901_v8 = vld [vmem:[%s4233_s9 + $0x60] sm:$0xff] }
 0x30e   :  { %2763 = vmatprep.subr.bf16.mxu0 %v2762_v33  ;;  %v2782_v30 = vpack.c.bf16 %v902_v27, %v901_v8 }
 0x310   :  { %2354 = vmatmul.mubr.f32.gmra.mrb[34].mxu0 %v3347_v49 }
 0x311   :  { %2765 = vmatpush3.bf16.msra.mxu0 %v2762_v33  ;;  %2356 = vmatprep.mubr.f32.mxu0 %v3352_v50  ;;  %v903_v33 = vld [vmem:[%s4233_s9 + $0x70] sm:$0xff] }
 0x312   :  { %2767 = vmatprep.subr.bf16.mxu0 %v2766_v17  ;;  %v2786_v39 = vpack.c.bf16 %v904_v36, %v903_v33 }
 0x314   :  { %2357 = vmatmul.mubr.f32.gmra.mrb[36].mxu0 %v3365_v54 }
 0x315   :  { %2769 = vmatpush3.bf16.msra.mxu0 %v2766_v17  ;;  %2359 = vmatprep.mubr.f32.mxu0 %v3370_v55  ;;  %v1395_v17 = vld [vmem:[%s4234_s10] sm:$0xff] }
 0x316   :  { %2771 = vmatprep.subr.bf16.mxu0 %v2770_v42  ;;  %v3668_v23 = vpack.c.bf16 %v1396_v20, %v1395_v17 }
 0x318   :  { %2360 = vmatmul.mubr.f32.gmra.mrb[38].mxu0 %v3383_v59 }
 0x319   :  { %2773 = vmatpush3.bf16.msra.mxu0 %v2770_v42  ;;  %2362 = vmatprep.mubr.f32.mxu0 %v3388_v60  ;;  %v1397_v42 = vld [vmem:[%s4234_s10 + $0x10] sm:$0xff] }
 0x31a   :  { %2775 = vmatprep.subr.bf16.mxu0 %v2774_v57  ;;  %v3680_v52 = vpack.c.bf16 %v1398_v47, %v1397_v42 }
 0x31c   :  { %2363 = vmatmul.mubr.f32.gmra.mrb[40].mxu0 %v3401_v0 }
 0x31d   :  { %2777 = vmatpush3.bf16.msra.mxu0 %v2774_v57  ;;  %2365 = vmatprep.mubr.f32.mxu0 %v3406_v1  ;;  %v1399_v57 = vld [vmem:[%s4234_s10 + $0x20] sm:$0xff] }
 0x31e   :  { %2779 = vmatprep.subr.bf16.mxu0 %v2778_v9  ;;  %v3694_v31 = vpack.c.bf16 %v1400_v62, %v1399_v57 }
 0x320   :  { %2366 = vmatmul.mubr.f32.gmra.mrb[42].mxu0 %v3419_v5 }
 0x321   :  { %2781 = vmatpush3.bf16.msra.mxu0 %v2778_v9  ;;  %2368 = vmatprep.mubr.f32.mxu0 %v3424_v6 }
 0x322   :  { %2783 = vmatprep.subr.bf16.mxu0 %v2782_v30 }
 0x324   :  { %2369 = vmatmul.mubr.f32.gmra.mrb[44].mxu0 %v3437_v11 }
 0x325   :  { %2785 = vmatpush3.bf16.msra.mxu0 %v2782_v30  ;;  %2371 = vmatprep.mubr.f32.mxu0 %v3442_v12 }
 0x326   :  { %2787 = vmatprep.subr.bf16.mxu0 %v2786_v39 }
 0x328   :  { %2372 = vmatmul.mubr.f32.gmra.mrb[46].mxu0 %v3449_v14 }
 0x329   :  { %2789 = vmatpush3.bf16.msra.mxu0 %v2786_v39  ;;  %2406 = vmatprep.mubr.f32.mxu0 %v560_v32  ;;  %v1401_v32 = vld [vmem:[%s4234_s10 + $0x30] sm:$0xff] }
 0x32a   :  { %2855 = vmatprep.subr.bf16.mxu0 %v3668_v23  ;;  %v3708_v29 = vpack.c.bf16 %v1402_v3, %v1401_v32 }
 0x32c   :  { %2407 = vmatmul.mubr.f32.vlgmr.msra.gmra.mrb[32].mxu0 %v561_v34  ;;  %v1403_v34 = vld [vmem:[%s4234_s10 + $0x40] sm:$0xff] }
 0x32d   :  { %2409 = vmatprep.mubr.f32.mxu0 %v562_v38  ;;  %2857 = vmatpush3.bf16.msra.mxu0 %v3668_v23  ;;  %v3722_v35 = vpack.c.bf16 %v1404_v37, %v1403_v34  ;;  %v1405_v38 = vld [vmem:[%s4234_s10 + $0x50] sm:$0xff] }
 0x32e   :  { %2859 = vmatprep.subr.bf16.mxu0 %v3680_v52 }
 0x330   :  { %2410 = vmatmul.mubr.f32.gmra.mrb[34].mxu0 %v563_v15  ;;  %v1406_v15 = vld [vmem:[%s4234_s10 + $0x58] sm:$0xff] }
 0x331   :  { %2412 = vmatprep.mubr.f32.mxu0 %v564_v19  ;;  %2861 = vmatpush3.bf16.msra.mxu0 %v3680_v52  ;;  %v3736_v16 = vpack.c.bf16 %v1406_v15, %v1405_v38  ;;  %v1408_v19 = vld [vmem:[%s4234_s10 + $0x68] sm:$0xff] }
 0x332   :  { %2863 = vmatprep.subr.bf16.mxu0 %v3694_v31 }
 0x334   :  { %2413 = vmatmul.mubr.f32.gmra.mrb[36].mxu0 %v565_v21  ;;  %v3750_v21 = vpack.c.bf16 %v1408_v19, %v1407_v18 }
 0x335   :  { %2415 = vmatprep.mubr.f32.mxu0 %v566_v41  ;;  %2865 = vmatpush3.bf16.msra.mxu0 %v3694_v31  ;;  %v1409_v41 = vld [vmem:[%s4234_s10 + $0x70] sm:$0xff] }
 0x336   :  { %2867 = vmatprep.subr.bf16.mxu0 %v3708_v29  ;;  %v3777_v48 = vpack.c.bf16 %v1410_v46, %v1409_v41 }
 0x338   :  { %2416 = vmatmul.mubr.f32.gmra.mrb[38].mxu0 %v567_v43  ;;  %v2818_v43 = vpack.c.bf16 %v1097_v24, %v1096_v22 }
 0x339   :  { %2418 = vmatprep.mubr.f32.mxu0 %v568_v51  ;;  %2869 = vmatpush3.bf16.msra.mxu0 %v3708_v29  ;;  %v3784_v51 = vld [vmem:[%s4235_s6] ss:$0 sm:$0xff] }
 0x33a   :  { %2871 = vmatprep.subr.bf16.mxu0 %v3722_v35  ;;  %2819 = vmatprep.subr.bf16.mxu1 %v2818_v43 }
 0x33b   :  { %2821 = vmatpush3.bf16.msra.mxu1 %v2818_v43 }
 0x33c   :  { %2419 = vmatmul.mubr.f32.gmra.mrb[40].mxu0 %v569_v53 }
 0x33d   :  { %2421 = vmatprep.mubr.f32.mxu0 %v570_v61  ;;  %2873 = vmatpush3.bf16.msra.mxu0 %v3722_v35 }
 0x33e   :  { %2875 = vmatprep.subr.bf16.mxu0 %v3736_v16 }
 0x340   :  { %2422 = vmatmul.mubr.f32.gmra.mrb[42].mxu0 %v571_v63 }
 0x341   :  { %2424 = vmatprep.mubr.f32.mxu0 %v572_v7  ;;  %2877 = vmatpush3.bf16.msra.mxu0 %v3736_v16 }
 0x342   :  { %2879 = vmatprep.subr.bf16.mxu0 %v3750_v21 }
 0x344   :  { %2425 = vmatmul.mubr.f32.gmra.mrb[44].mxu0 %v573_v10 }
 0x345   :  { %2427 = vmatprep.mubr.f32.mxu0 %v574_v26  ;;  %2881 = vmatpush3.bf16.msra.mxu0 %v3750_v21 }
 0x346   :  { %2883 = vmatprep.subr.bf16.mxu0 %v3777_v48 }
 0x348   :  { %2428 = vmatmul.mubr.f32.gmra.mrb[46].mxu0 %v575_v28 }
 0x349   :  { %2885 = vmatpush3.bf16.msra.mxu0 %v3777_v48 }
 0x3ff   :  { %v2408_v53 = vpop.f32.mrb[32].mxu0 }
 0x400   :  { %v2918_v56 = vadd.f32 %v2408_v53, %v3784_v51  ;;  %v971_v58 = vpop.f32.mrb[33].mxu0 }
 0x401   :  { %v2919_v61 = vadd.f32 %v3784_v51, %v971_v58 }
 0x402   :  { %v1067_v4 = vmax.f32 %v2918_v56, 0.0 }
 0x403   :  { %v1066_v63 = vmax.f32 %v2919_v61, 0.0  ;;  %v2411_v2 = vpop.f32.mrb[34].mxu0 }
 0x404   :  { %v2920_v7 = vadd.f32 %v2411_v2, %v3784_v51  ;;  %v981_v10 = vpop.f32.mrb[35].mxu0 }
 0x405   :  { %v2921_v13 = vadd.f32 %v3784_v51, %v981_v10  ;;  %2462 = vmatprep.mubr.f32.mxu1 %v1066_v63  ;;  %2574 = vmatprep.mubr.f32.mxu0 %v1066_v63 }
 0x406   :  { %2463 = vmatmul.mubr.f32.vlgmr.msra.gmra.mrb[16].mxu1 %v1067_v4  ;;  %2575 = vmatmul.mubr.f32.vlgmr.msra.gmra.mrb[48].mxu0 %v1067_v4  ;;  %v1069_v28 = vmax.f32 %v2920_v7, 0.0 }
 0x407   :  { %v1068_v25 = vmax.f32 %v2921_v13, 0.0  ;;  %v2414_v26 = vpop.f32.mrb[36].mxu0 }
 0x408   :  { %v2922_v9 = vadd.f32 %v2414_v26, %v3784_v51  ;;  %v991_v8 = vpop.f32.mrb[37].mxu0 }
 0x409   :  { %v2923_v27 = vadd.f32 %v3784_v51, %v991_v8  ;;  %2465 = vmatprep.mubr.f32.mxu1 %v1068_v25  ;;  %2577 = vmatprep.mubr.f32.mxu0 %v1068_v25 }
 0x40a   :  { %2466 = vmatmul.mubr.f32.gmra.mrb[18].mxu1 %v1069_v28  ;;  %2578 = vmatmul.mubr.f32.gmra.mrb[50].mxu0 %v1069_v28  ;;  %v1071_v36 = vmax.f32 %v2922_v9, 0.0 }
 0x40b   :  { %v1070_v30 = vmax.f32 %v2923_v27, 0.0  ;;  %v2417_v33 = vpop.f32.mrb[38].mxu0 }
 0x40c   :  { %v2924_v39 = vadd.f32 %v2417_v33, %v3784_v51  ;;  %v1001_v17 = vpop.f32.mrb[39].mxu0 }
 0x40d   :  { %v2925_v20 = vadd.f32 %v3784_v51, %v1001_v17  ;;  %2468 = vmatprep.mubr.f32.mxu1 %v1070_v30  ;;  %2580 = vmatprep.mubr.f32.mxu0 %v1070_v30 }
 0x40e   :  { %2469 = vmatmul.mubr.f32.gmra.mrb[20].mxu1 %v1071_v36  ;;  %2581 = vmatmul.mubr.f32.gmra.mrb[52].mxu0 %v1071_v36  ;;  %v1073_v57 = vmax.f32 %v2924_v39, 0.0 }
 0x40f   :  { %v1072_v42 = vmax.f32 %v2925_v20, 0.0  ;;  %v2420_v47 = vpop.f32.mrb[40].mxu0 }
 0x410   :  { %v3795_v62 = vadd.f32 %v2420_v47, %v3784_v51  ;;  %v1011_v32 = vpop.f32.mrb[41].mxu0 }
 0x411   :  { %v3798_v3 = vadd.f32 %v3784_v51, %v1011_v32  ;;  %2471 = vmatprep.mubr.f32.mxu1 %v1072_v42  ;;  %2583 = vmatprep.mubr.f32.mxu0 %v1072_v42 }
 0x412   :  { %2472 = vmatmul.mubr.f32.gmra.mrb[22].mxu1 %v1073_v57  ;;  %2584 = vmatmul.mubr.f32.gmra.mrb[54].mxu0 %v1073_v57  ;;  %v1075_v38 = vmax.f32 %v3795_v62, 0.0 }
 0x413   :  { %v1074_v34 = vmax.f32 %v3798_v3, 0.0  ;;  %v2423_v37 = vpop.f32.mrb[42].mxu0 }
 0x414   :  { %v3803_v15 = vadd.f32 %v2423_v37, %v3784_v51  ;;  %v1021_v18 = vpop.f32.mrb[43].mxu0 }
 0x415   :  { %v3806_v19 = vadd.f32 %v3784_v51, %v1021_v18  ;;  %2474 = vmatprep.mubr.f32.mxu1 %v1074_v34 }
 0x416   :  { %2475 = vmatmul.mubr.f32.gmra.mrb[24].mxu1 %v1075_v38  ;;  %v1077_v41 = vmax.f32 %v3803_v15, 0.0 }
 0x417   :  { %v1076_v22 = vmax.f32 %v3806_v19, 0.0  ;;  %v2426_v24 = vpop.f32.mrb[44].mxu0 }
 0x418   :  { %v3815_v43 = vadd.f32 %v2426_v24, %v3784_v51  ;;  %v1031_v46 = vpop.f32.mrb[45].mxu0 }
 0x419   :  { %v3818_v53 = vadd.f32 %v3784_v51, %v1031_v46  ;;  %2477 = vmatprep.mubr.f32.mxu1 %v1076_v22 }
 0x41a   :  { %2478 = vmatmul.mubr.f32.gmra.mrb[26].mxu1 %v1077_v41  ;;  %v1079_v61 = vmax.f32 %v3815_v43, 0.0 }
 0x41b   :  { %v1078_v56 = vmax.f32 %v3818_v53, 0.0  ;;  %v2429_v58 = vpop.f32.mrb[46].mxu0 }
 0x41c   :  { %v3827_v63 = vadd.f32 %v2429_v58, %v3784_v51  ;;  %v1041_v2 = vpop.f32.mrb[47].mxu0 }
 0x41d   :  { %v3830_v4 = vadd.f32 %v3784_v51, %v1041_v2  ;;  %2480 = vmatprep.mubr.f32.mxu1 %v1078_v56 }
 0x41e   :  { %2481 = vmatmul.mubr.f32.gmra.mrb[28].mxu1 %v1079_v61  ;;  %v1081_v10 = vmax.f32 %v3827_v63, 0.0 }
 0x41f   :  { %v1080_v7 = vmax.f32 %v3830_v4, 0.0 }
 0x421   :  { %2483 = vmatprep.mubr.f32.mxu1 %v1080_v7 }
 0x422   :  { %2484 = vmatmul.mubr.f32.gmra.mrb[30].mxu1 %v1081_v10 }
 0x423   :  { %2518 = vmatprep.mubr.f32.mxu1 %v3269_v40 }
 0x4d9   :  { %v2464_v51 = vpop.f32.mrb[16].mxu1  ;;  %v3843_v13 = vpop.f32.mrb[48].mxu0 }
 0x4da   :  { %v1164_v25 = vpop.f32.mrb[17].mxu1  ;;  %v3845_v26 = vpop.f32.mrb[49].mxu0 }
 0x4db   :  { %v2822_v28 = vpack.c.bf16 %v2464_v51, %v1164_v25 }
 0x4dd   :  { %v2467_v9 = vpop.f32.mrb[18].mxu1  ;;  %2823 = vmatprep.subr.bf16.mxu1 %v2822_v28  ;;  %v3847_v8 = vpop.f32.mrb[50].mxu0 }
 0x4de   :  { %v1174_v27 = vpop.f32.mrb[19].mxu1  ;;  %2825 = vmatpush3.bf16.msra.mxu1 %v2822_v28  ;;  %v3849_v30 = vpop.f32.mrb[51].mxu0 }
 0x4df   :  { %v2826_v33 = vpack.c.bf16 %v2467_v9, %v1174_v27 }
 0x4e1   :  { %v2470_v36 = vpop.f32.mrb[20].mxu1  ;;  %2827 = vmatprep.subr.bf16.mxu1 %v2826_v33  ;;  %v3851_v39 = vpop.f32.mrb[52].mxu0 }
 0x4e2   :  { %v1184_v40 = vpop.f32.mrb[21].mxu1  ;;  %2829 = vmatpush3.bf16.msra.mxu1 %v2826_v33  ;;  %v3853_v17 = vpop.f32.mrb[53].mxu0 }
 0x4e3   :  { %v2830_v20 = vpack.c.bf16 %v2470_v36, %v1184_v40 }
 0x4e5   :  { %v2473_v42 = vpop.f32.mrb[22].mxu1  ;;  %2831 = vmatprep.subr.bf16.mxu1 %v2830_v20  ;;  %v3855_v47 = vpop.f32.mrb[54].mxu0 }
 0x4e6   :  { %v1194_v57 = vpop.f32.mrb[23].mxu1  ;;  %2833 = vmatpush3.bf16.msra.mxu1 %v2830_v20  ;;  %v3857_v32 = vpop.f32.mrb[55].mxu0 }
 0x4e7   :  { %v2834_v37 = vpack.c.bf16 %v2473_v42, %v1194_v57 }
 0x4e9   :  { %v2476_v18 = vpop.f32.mrb[24].mxu1  ;;  %2835 = vmatprep.subr.bf16.mxu1 %v2834_v37 }
 0x4ea   :  { %v1204_v24 = vpop.f32.mrb[25].mxu1  ;;  %2837 = vmatpush3.bf16.msra.mxu1 %v2834_v37 }
 0x4eb   :  { %v2838_v46 = vpack.c.bf16 %v2476_v18, %v1204_v24 }
 0x4ed   :  { %v2479_v58 = vpop.f32.mrb[26].mxu1  ;;  %2839 = vmatprep.subr.bf16.mxu1 %v2838_v46 }
 0x4ee   :  { %v1214_v2 = vpop.f32.mrb[27].mxu1  ;;  %2841 = vmatpush3.bf16.msra.mxu1 %v2838_v46 }
 0x4ef   :  { %v2842_v51 = vpack.c.bf16 %v2479_v58, %v1214_v2 }
 0x4f1   :  { %v2482_v25 = vpop.f32.mrb[28].mxu1  ;;  %2843 = vmatprep.subr.bf16.mxu1 %v2842_v51 }
 0x4f2   :  { %v1224_v28 = vpop.f32.mrb[29].mxu1  ;;  %2845 = vmatpush3.bf16.msra.mxu1 %v2842_v51 }
 0x4f3   :  { %v2846_v9 = vpack.c.bf16 %v2482_v25, %v1224_v28 }
 0x4f5   :  { %v2485_v27 = vpop.f32.mrb[30].mxu1  ;;  %2847 = vmatprep.subr.bf16.mxu1 %v2846_v9 }
 0x4f6   :  { %v1234_v33 = vpop.f32.mrb[31].mxu1  ;;  %2849 = vmatpush3.bf16.msra.mxu1 %v2846_v9 }
 0x4f7   :  { %v2850_v36 = vpack.c.bf16 %v2485_v27, %v1234_v33 }
 0x4f9   :  { %2851 = vmatprep.subr.bf16.mxu1 %v2850_v36 }
 0x4fa   :  { %2853 = vmatpush3.bf16.msra.mxu1 %v2850_v36 }
 0x4fb   :  { %2886 = vmatprep.subr.bf16.mxu1 %v3668_v23 }
 0x4fd   :  { %2519 = vmatmul.mubr.f32.vlgmr.msra.gmra.mrb[32].mxu1 %v3329_v44  ;;  %v1572_v44 = vlaneseq }
 0x4fe   :  { %2894 = vmatpush3.bf16.msra.mxu1 %v3668_v23  ;;  %2521 = vmatprep.mubr.f32.mxu1 %v3334_v45  ;;  %v3909_v45 = vld [vmem:[%s4236_s7] ss:$0 sm:$0xff] }
 0x4ff   :  { %2887 = vmatprep.subr.bf16.mxu1 %v3680_v52 }
 0x501   :  { %2522 = vmatmul.mubr.f32.gmra.mrb[34].mxu1 %v3347_v49  ;;  %v3911_v49 = vand.u32 127, %v1572_v44 }
 0x502   :  { %2895 = vmatpush3.bf16.msra.mxu1 %v3680_v52  ;;  %2524 = vmatprep.mubr.f32.mxu1 %v3352_v50 }
 0x503   :  { %2888 = vmatprep.subr.bf16.mxu1 %v3694_v31  ;;  %vm1574_vm0 = vcmp.lt.s32.totalorder %v3911_v49, 8 }
 0x505   :  { %2525 = vmatmul.mubr.f32.gmra.mrb[36].mxu1 %v3365_v54 }
 0x506   :  { %2896 = vmatpush3.bf16.msra.mxu1 %v3694_v31  ;;  %2527 = vmatprep.mubr.f32.mxu1 %v3370_v55 }
 0x507   :  { %2889 = vmatprep.subr.bf16.mxu1 %v3708_v29 }
 0x509   :  { %2528 = vmatmul.mubr.f32.gmra.mrb[38].mxu1 %v3383_v59 }
 0x50a   :  { %2897 = vmatpush3.bf16.msra.mxu1 %v3708_v29  ;;  %2530 = vmatprep.mubr.f32.mxu1 %v3388_v60 }
 0x50b   :  { %2890 = vmatprep.subr.bf16.mxu1 %v3722_v35 }
 0x50d   :  { %2531 = vmatmul.mubr.f32.gmra.mrb[40].mxu1 %v3401_v0 }
 0x50e   :  { %2898 = vmatpush3.bf16.msra.mxu1 %v3722_v35  ;;  %2533 = vmatprep.mubr.f32.mxu1 %v3406_v1 }
 0x50f   :  { %2891 = vmatprep.subr.bf16.mxu1 %v3736_v16 }
 0x511   :  { %2534 = vmatmul.mubr.f32.gmra.mrb[42].mxu1 %v3419_v5 }
 0x512   :  { %2899 = vmatpush3.bf16.msra.mxu1 %v3736_v16  ;;  %2536 = vmatprep.mubr.f32.mxu1 %v3424_v6 }
 0x513   :  { %2892 = vmatprep.subr.bf16.mxu1 %v3750_v21 }
 0x515   :  { %2537 = vmatmul.mubr.f32.gmra.mrb[44].mxu1 %v3437_v11 }
 0x516   :  { %2900 = vmatpush3.bf16.msra.mxu1 %v3750_v21  ;;  %2539 = vmatprep.mubr.f32.mxu1 %v3442_v12 }
 0x517   :  { %2893 = vmatprep.subr.bf16.mxu1 %v3777_v48 }
 0x519   :  { %2540 = vmatmul.mubr.f32.gmra.mrb[46].mxu1 %v3449_v14 }
 0x51a   :  { %2901 = vmatpush3.bf16.msra.mxu1 %v3777_v48  ;;  %2586 = vmatprep.mubr.f32.mxu1 %v1074_v34 }
 0x51d   :  { %2587 = vmatmul.mubr.f32.vlgmr.msra.gmra.mrb[40].mxu1 %v1075_v38 }
 0x51e   :  { %2589 = vmatprep.mubr.f32.mxu1 %v1076_v22 }
 0x521   :  { %2590 = vmatmul.mubr.f32.gmra.mrb[42].mxu1 %v1077_v41 }
 0x522   :  { %2592 = vmatprep.mubr.f32.mxu1 %v1078_v56 }
 0x525   :  { %2593 = vmatmul.mubr.f32.gmra.mrb[44].mxu1 %v1079_v61 }
 0x526   :  { %2595 = vmatprep.mubr.f32.mxu1 %v1080_v7 }
 0x529   :  { %2596 = vmatmul.mubr.f32.gmra.mrb[46].mxu1 %v1081_v10 }
 0x5d0   :  { %v2520_v50 = vpop.f32.mrb[32].mxu1 }
 0x5d1   :  { %v1322_v54 = vadd.f32 %v2520_v50, %v3909_v45  ;;  %v1316_v55 = vpop.f32.mrb[33].mxu1 }
 0x5d2   :  { %v1317_v59 = vadd.f32 %v3909_v45, %v1316_v55 }
 0x5d3   :  { %v3917_v60 = vadd.f32 %v3843_v13, %v1322_v54 }
 0x5d4   :  { %v2523_v0 = vpop.f32.mrb[34].mxu1  ;;  %v3920_v1 = vadd.f32 %v3845_v26, %v1317_v59 }
 0x5d5   :  { %v1332_v5 = vadd.f32 %v2523_v0, %v3909_v45  ;;  %v1326_v6 = vpop.f32.mrb[35].mxu1  ;;  %v3926_v11 = vsel %vm1574_vm0, %v3917_v60, -1e+30 }
 0x5d6   :  { %v1327_v12 = vadd.f32 %v3909_v45, %v1326_v6  ;;  %1593 = vmax.xlane.f32.xlu0 %v3926_v11  ;;  %v3945_v16 = vsel %vm1574_vm0, %v3920_v1, -1e+30 }
 0x5d7   :  { %v3931_v14 = vadd.f32 %v3847_v8, %v1332_v5 }
 0x5d8   :  { %v2526_v23 = vpop.f32.mrb[36].mxu1  ;;  %v3934_v52 = vadd.f32 %v3849_v30, %v1327_v12 }
 0x5d9   :  { %v1342_v31 = vadd.f32 %v2526_v23, %v3909_v45  ;;  %v1336_v29 = vpop.f32.mrb[37].mxu1  ;;  %v3940_v35 = vsel %vm1574_vm0, %v3931_v14, -1e+30 }
 0x5da   :  { %v1337_v21 = vadd.f32 %v3909_v45, %v1336_v29  ;;  %1597 = vmax.xlane.f32.xlu1 %v3940_v35  ;;  %1591 = vmax.xlane.f32.xlu0 %v3945_v16  ;;  %v1577_v15 = vsel %vm1574_vm0, %v3934_v52, -1e+30 }
 0x5db   :  { %v3951_v48 = vadd.f32 %v3851_v39, %v1342_v31 }
 0x5dc   :  { %v2529_v62 = vpop.f32.mrb[38].mxu1  ;;  %v3954_v3 = vadd.f32 %v3853_v17, %v1337_v21 }
 0x5dd   :  { %v1352_v34 = vadd.f32 %v2529_v62, %v3909_v45  ;;  %v1346_v38 = vpop.f32.mrb[39].mxu1  ;;  %v1580_v53 = vsel %vm1574_vm0, %v3951_v48, -1e+30 }
 0x5de   :  { %v1347_v19 = vadd.f32 %v3909_v45, %v1346_v38  ;;  %1595 = vmax.xlane.f32.xlu1 %v1577_v15  ;;  %v1579_v22 = vsel %vm1574_vm0, %v3954_v3, -1e+30 }
 0x5df   :  { %1599 = vmax.xlane.f32.xlu0 %v1579_v22  ;;  %v3965_v41 = vadd.f32 %v3855_v47, %v1352_v34 }
 0x5e0   :  { %v3968_v43 = vadd.f32 %v3857_v32, %v1347_v19 }
 0x5e1   :  { %v3979_v61 = vsel %vm1574_vm0, %v3965_v41, -1e+30 }
 0x5e2   :  { %1601 = vmax.xlane.f32.xlu1 %v1580_v53  ;;  %v1581_v56 = vsel %vm1574_vm0, %v3968_v43, -1e+30 }
 0x5e3   :  { %1603 = vmax.xlane.f32.xlu0 %v1581_v56 }
 0x5e6   :  { %1605 = vmax.xlane.f32.xlu1 %v3979_v61 }
 0x5f0   :  { %v2588_v63 = vpop.f32.mrb[40].mxu1 }
 0x5f1   :  { %v3983_v4 = vadd.f32 %v2588_v63, %v3909_v45  ;;  %v1517_v7 = vpop.f32.mrb[41].mxu1 }
 0x5f2   :  { %v3986_v10 = vadd.f32 %v3909_v45, %v1517_v7 }
 0x5f3   :  { %v3991_v13 = vsel %vm1574_vm0, %v3983_v4, -1e+30 }
 0x5f4   :  { %v2591_v26 = vpop.f32.mrb[42].mxu1  ;;  %1609 = vmax.xlane.f32.xlu1 %v3991_v13  ;;  %v3997_v8 = vsel %vm1574_vm0, %v3986_v10, -1e+30 }
 0x5f5   :  { %v4000_v30 = vadd.f32 %v2591_v26, %v3909_v45  ;;  %v1527_v39 = vpop.f32.mrb[43].mxu1  ;;  %1607 = vmax.xlane.f32.xlu0 %v3997_v8 }
 0x5f6   :  { %v4004_v40 = vadd.f32 %v3909_v45, %v1527_v39 }
 0x5f7   :  { %v4009_v17 = vsel %vm1574_vm0, %v4000_v30, -1e+30 }
 0x5f8   :  { %v2594_v20 = vpop.f32.mrb[44].mxu1  ;;  %1613 = vmax.xlane.f32.xlu1 %v4009_v17  ;;  %v4015_v42 = vsel %vm1574_vm0, %v4004_v40, -1e+30 }
 0x5f9   :  { %v4018_v47 = vadd.f32 %v2594_v20, %v3909_v45  ;;  %v1537_v57 = vpop.f32.mrb[45].mxu1  ;;  %1611 = vmax.xlane.f32.xlu0 %v4015_v42 }
 0x5fa   :  { %v4022_v32 = vadd.f32 %v3909_v45, %v1537_v57 }
 0x5fb   :  { %v4027_v37 = vsel %vm1574_vm0, %v4018_v47, -1e+30 }
 0x5fc   :  { %v2597_v18 = vpop.f32.mrb[46].mxu1  ;;  %1617 = vmax.xlane.f32.xlu1 %v4027_v37  ;;  %v4033_v24 = vsel %vm1574_vm0, %v4022_v32, -1e+30 }
 0x5fd   :  { %v4036_v46 = vadd.f32 %v2597_v18, %v3909_v45  ;;  %v1547_v58 = vpop.f32.mrb[47].mxu1  ;;  %1615 = vmax.xlane.f32.xlu0 %v4033_v24 }
 0x5fe   :  { %v4040_v2 = vadd.f32 %v3909_v45, %v1547_v58 }
 0x5ff   :  { %v4045_v51 = vsel %vm1574_vm0, %v4036_v46, -1e+30 }
 0x600   :  { %1621 = vmax.xlane.f32.xlu1 %v4045_v51  ;;  %v4051_v25 = vsel %vm1574_vm0, %v4040_v2, -1e+30 }
 0x601   :  { %1619 = vmax.xlane.f32.xlu0 %v4051_v25 }
 0x663   :  { %v4054_v28 = vpop.xlane.xlu0 %1593 }
 0x664   :  { %v1624_v9 = vsub.f32 %v3926_v11, %v4054_v28 }
 0x666   :  { %v1641_v27 = vmul.f32 1.442695, %v1624_v9 }
 0x667   :  { %v4058_v33 = vpop.xlane.xlu1 %1597  ;;  %v4060_v36 = vpop.xlane.xlu0 %1591 }
 0x668   :  { %2998 = vpow2.f32 %v1641_v27  ;;  %v1626_v44 = vsub.f32 %v3940_v35, %v4058_v33  ;;  %v1623_v45 = vsub.f32 %v3945_v16, %v4060_v36 }
 0x66a   :  { %v1645_v50 = vmul.f32 1.442695, %v1626_v44  ;;  %v1639_v54 = vmul.f32 1.442695, %v1623_v45 }
 0x66b   :  { %v4066_v55 = vpop.xlane.xlu1 %1595 }
 0x66c   :  { %3000 = vpow2.f32 %v1645_v50  ;;  %v1625_v59 = vsub.f32 %v1577_v15, %v4066_v55  ;;  %v4069_v0 = vpop.xlane.xlu0 %1599 }
 0x66d   :  { %3002 = vpow2.f32 %v1639_v54  ;;  %v1627_v5 = vsub.f32 %v1579_v22, %v4069_v0 }
 0x66e   :  { %v1643_v6 = vmul.f32 1.442695, %v1625_v59 }
 0x66f   :  { %v1647_v11 = vmul.f32 1.442695, %v1627_v5  ;;  %v4072_v12 = vpop.xlane.xlu1 %1601 }
 0x670   :  { %3004 = vpow2.f32 %v1643_v6  ;;  %v1628_v23 = vsub.f32 %v1580_v53, %v4072_v12  ;;  %v4075_v31 = vpop.xlane.xlu0 %1603 }
 0x671   :  { %v1629_v29 = vsub.f32 %v1581_v56, %v4075_v31  ;;  %3006 = vpow2.f32 %v1647_v11 }
 0x672   :  { %v2999_v35 = vpop.eup %2998  ;;  %v1649_v16 = vmul.f32 1.442695, %v1628_v23 }
 0x673   :  { %v1651_v21 = vmul.f32 1.442695, %v1629_v29  ;;  %v4078_v62 = vpop.xlane.xlu1 %1605  ;;  %v1672_v34 = vsel %vm1574_vm0, %v2999_v35, 0.0 }
 0x674   :  { %3008 = vpow2.f32 %v1649_v16  ;;  %v1630_v38 = vsub.f32 %v3979_v61, %v4078_v62  ;;  %1689 = vadd.xlane.f32.xlu1 %v1672_v34 }
 0x675   :  { %3010 = vpow2.f32 %v1651_v21 }
 0x676   :  { %v3001_v15 = vpop.eup %3000  ;;  %v1653_v19 = vmul.f32 1.442695, %v1630_v38 }
 0x677   :  { %v3003_v22 = vpop.eup %3002  ;;  %v1674_v53 = vsel %vm1574_vm0, %v3001_v15, 0.0 }
 0x678   :  { %3012 = vpow2.f32 %v1653_v19  ;;  %1693 = vadd.xlane.f32.xlu1 %v1674_v53  ;;  %v1671_v56 = vsel %vm1574_vm0, %v3003_v22, 0.0 }
 0x679   :  { %1687 = vadd.xlane.f32.xlu0 %v1671_v56 }
 0x67a   :  { %v3005_v63 = vpop.eup %3004 }
 0x67b   :  { %v1673_v7 = vsel %vm1574_vm0, %v3005_v63, 0.0  ;;  %v3007_v26 = vpop.eup %3006 }
 0x67c   :  { %v1675_v20 = vsel %vm1574_vm0, %v3007_v26, 0.0 }
 0x67d   :  { %1691 = vadd.xlane.f32.xlu0 %v1673_v7 }
 0x67e   :  { %v3009_v61 = vpop.eup %3008 }
 0x67f   :  { %v1676_v39 = vsel %vm1574_vm0, %v3009_v61, 0.0  ;;  %v3011_v57 = vpop.eup %3010 }
 0x680   :  { %1697 = vadd.xlane.f32.xlu1 %v1676_v39  ;;  %v1677_v54 = vsel %vm1574_vm0, %v3011_v57, 0.0 }
 0x681   :  { %1695 = vadd.xlane.f32.xlu0 %v1675_v20  ;;  %v4094_v18 = vpop.xlane.xlu1 %1609 }
 0x682   :  { %v3013_v58 = vpop.eup %3012  ;;  %v1632_v9 = vsub.f32 %v3991_v13, %v4094_v18  ;;  %v4098_v27 = vpop.xlane.xlu0 %1607 }
 0x683   :  { %v1631_v44 = vsub.f32 %v3997_v8, %v4098_v27  ;;  %v1678_v45 = vsel %vm1574_vm0, %v3013_v58, 0.0 }
 0x684   :  { %v1657_v50 = vmul.f32 1.442695, %v1632_v9  ;;  %1701 = vadd.xlane.f32.xlu1 %v1678_v45 }
 0x685   :  { %v1655_v59 = vmul.f32 1.442695, %v1631_v44  ;;  %1699 = vadd.xlane.f32.xlu0 %v1677_v54  ;;  %v4106_v5 = vpop.xlane.xlu1 %1613 }
 0x686   :  { %3014 = vpow2.f32 %v1657_v50  ;;  %v1634_v13 = vsub.f32 %v4009_v17, %v4106_v5  ;;  %v4110_v6 = vpop.xlane.xlu0 %1611 }
 0x687   :  { %3016 = vpow2.f32 %v1655_v59  ;;  %v1633_v8 = vsub.f32 %v4015_v42, %v4110_v6 }
 0x688   :  { %v1661_v11 = vmul.f32 1.442695, %v1634_v13 }
 0x689   :  { %v1659_v23 = vmul.f32 1.442695, %v1633_v8  ;;  %v4114_v29 = vpop.xlane.xlu1 %1617 }
 0x68a   :  { %3018 = vpow2.f32 %v1661_v11  ;;  %v1636_v35 = vsub.f32 %v4027_v37, %v4114_v29  ;;  %v4118_v16 = vpop.xlane.xlu0 %1615 }
 0x68b   :  { %3020 = vpow2.f32 %v1659_v23  ;;  %v1635_v17 = vsub.f32 %v4033_v24, %v4118_v16 }
 0x68c   :  { %v1665_v21 = vmul.f32 1.442695, %v1636_v35 }
 0x68d   :  { %v1663_v34 = vmul.f32 1.442695, %v1635_v17  ;;  %v4122_v38 = vpop.xlane.xlu1 %1621 }
 0x68e   :  { %3022 = vpow2.f32 %v1665_v21  ;;  %v1638_v42 = vsub.f32 %v4045_v51, %v4122_v38  ;;  %v4126_v15 = vpop.xlane.xlu0 %1619 }
 0x68f   :  { %3024 = vpow2.f32 %v1663_v34  ;;  %v1637_v37 = vsub.f32 %v4051_v25, %v4126_v15 }
 0x690   :  { %v3015_v19 = vpop.eup %3014  ;;  %v1669_v22 = vmul.f32 1.442695, %v1638_v42 }
 0x691   :  { %v3017_v53 = vpop.eup %3016  ;;  %v1667_v56 = vmul.f32 1.442695, %v1637_v37  ;;  %v1680_v24 = vsel %vm1574_vm0, %v3015_v19, 0.0 }
 0x692   :  { %3026 = vpow2.f32 %v1669_v22  ;;  %1705 = vadd.xlane.f32.xlu1 %v1680_v24  ;;  %v1679_v63 = vsel %vm1574_vm0, %v3017_v53, 0.0 }
 0x693   :  { %3028 = vpow2.f32 %v1667_v56  ;;  %1703 = vadd.xlane.f32.xlu0 %v1679_v63 }
 0x694   :  { %v3019_v51 = vpop.eup %3018 }
 0x695   :  { %v3021_v7 = vpop.eup %3020  ;;  %v1682_v26 = vsel %vm1574_vm0, %v3019_v51, 0.0 }
 0x696   :  { %1709 = vadd.xlane.f32.xlu1 %v1682_v26  ;;  %v1681_v25 = vsel %vm1574_vm0, %v3021_v7, 0.0 }
 0x697   :  { %1707 = vadd.xlane.f32.xlu0 %v1681_v25 }
 0x698   :  { %v3023_v61 = vpop.eup %3022 }
 0x699   :  { %v3025_v39 = vpop.eup %3024  ;;  %v1684_v20 = vsel %vm1574_vm0, %v3023_v61, 0.0 }
 0x69a   :  { %1713 = vadd.xlane.f32.xlu1 %v1684_v20  ;;  %v1683_v57 = vsel %vm1574_vm0, %v3025_v39, 0.0 }
 0x69b   :  { %1711 = vadd.xlane.f32.xlu0 %v1683_v57 }
 0x69c   :  { %v3027_v58 = vpop.eup %3026 }
 0x69d   :  { %v3029_v9 = vpop.eup %3028  ;;  %v1686_v44 = vsel %vm1574_vm0, %v3027_v58, 0.0 }
 0x69e   :  { %1717 = vadd.xlane.f32.xlu1 %v1686_v44  ;;  %v1685_v45 = vsel %vm1574_vm0, %v3029_v9, 0.0 }
 0x69f   :  { %1715 = vadd.xlane.f32.xlu0 %v1685_v45 }
 0x701   :  { %v1690_v50 = vpop.xlane.xlu1 %1689 }
 0x702   :  { %3030 = vlog2.f32 %v1690_v50 }
 0x705   :  { %v1694_v54 = vpop.xlane.xlu1 %1693 }
 0x706   :  { %3032 = vlog2.f32 %v1694_v54  ;;  %v1688_v59 = vpop.xlane.xlu0 %1687 }
 0x707   :  { %3034 = vlog2.f32 %v1688_v59 }
 0x70a   :  { %v1692_v13 = vpop.xlane.xlu0 %1691 }
 0x70b   :  { %3036 = vlog2.f32 %v1692_v13 }
 0x70c   :  { %v3031_v8 = vpop.eup %3030 }
 0x70d   :  { %v1722_v11 = vmul.f32 0.6931472, %v3031_v8  ;;  %v1698_v23 = vpop.xlane.xlu1 %1697 }
 0x70e   :  { %3038 = vlog2.f32 %v1698_v23  ;;  %v1696_v35 = vpop.xlane.xlu0 %1695 }
 0x70f   :  { %v1752_v17 = vadd.f32 %v1722_v11, %v4054_v28  ;;  %3040 = vlog2.f32 %v1696_v35 }
 0x710   :  { %v3033_v21 = vpop.eup %3032 }
 0x711   :  { %v3035_v49 = vpop.eup %3034  ;;  %v1768_v34 = vsub.f32 %v3917_v60, %v1752_v17  ;;  %v1726_v42 = vmul.f32 0.6931472, %v3033_v21  ;;  %v1702_v37 = vpop.xlane.xlu1 %1701 }
 0x712   :  { %v1720_v19 = vmul.f32 0.6931472, %v3035_v49  ;;  %3042 = vlog2.f32 %v1702_v37  ;;  %v1700_v22 = vpop.xlane.xlu0 %1699 }
 0x713   :  { %1784 = vst [vmem:[%s4237_s11 + $0x8] sm:$0xff] %v1768_v34  ;;  %v1754_v53 = vadd.f32 %v1726_v42, %v4058_v33  ;;  %3044 = vlog2.f32 %v1700_v22 }
 0x714   :  { %v1751_v56 = vadd.f32 %v1720_v19, %v4060_v36 }
 0x715   :  { %v3037_v28 = vpop.eup %3036  ;;  %v1770_v24 = vsub.f32 %v3931_v14, %v1754_v53 }
 0x716   :  { %v1767_v63 = vsub.f32 %v3920_v1, %v1751_v56  ;;  %v1724_v60 = vmul.f32 0.6931472, %v3037_v28 }
 0x717   :  { %1786 = vst [vmem:[%s4237_s11 + $0x18] sm:$0xff] %v1770_v24 }
 0x718   :  { %v3039_v51 = vpop.eup %3038  ;;  %1783 = vst [vmem:[%s4237_s11] sm:$0xff] %v1767_v63  ;;  %v1753_v33 = vadd.f32 %v1724_v60, %v4066_v55 }
 0x719   :  { %v3041_v7 = vpop.eup %3040  ;;  %v1730_v26 = vmul.f32 0.6931472, %v3039_v51 }
 0x71a   :  { %v1769_v36 = vsub.f32 %v3934_v52, %v1753_v33  ;;  %v1728_v25 = vmul.f32 0.6931472, %v3041_v7 }
 0x71b   :  { %v1756_v14 = vadd.f32 %v1730_v26, %v4072_v12 }
 0x71c   :  { %v3043_v1 = vpop.eup %3042  ;;  %1785 = vst [vmem:[%s4237_s11 + $0x10] sm:$0xff] %v1769_v36  ;;  %v1755_v61 = vadd.f32 %v1728_v25, %v4069_v0 }
 0x71d   :  { %v3045_v39 = vpop.eup %3044  ;;  %v1772_v20 = vsub.f32 %v3951_v48, %v1756_v14  ;;  %v1734_v57 = vmul.f32 0.6931472, %v3043_v1 }
 0x71e   :  { %v1771_v55 = vsub.f32 %v3954_v3, %v1755_v61  ;;  %v1732_v58 = vmul.f32 0.6931472, %v3045_v39 }
 0x71f   :  { %1788 = vst [vmem:[%s4237_s11 + $0x28] sm:$0xff] %v1772_v20  ;;  %v1758_v52 = vadd.f32 %v1734_v57, %v4078_v62  ;;  %v1706_v12 = vpop.xlane.xlu1 %1705 }
 0x720   :  { %1787 = vst [vmem:[%s4237_s11 + $0x20] sm:$0xff] %v1771_v55  ;;  %v1757_v0 = vadd.f32 %v1732_v58, %v4075_v31  ;;  %3046 = vlog2.f32 %v1706_v12  ;;  %v1704_v9 = vpop.xlane.xlu0 %1703 }
 0x721   :  { %v1774_v48 = vsub.f32 %v3965_v41, %v1758_v52  ;;  %3048 = vlog2.f32 %v1704_v9 }
 0x722   :  { %v1773_v3 = vsub.f32 %v3968_v43, %v1757_v0 }
 0x723   :  { %1790 = vst [vmem:[%s4237_s11 + $0x38] sm:$0xff] %v1774_v48  ;;  %v1710_v44 = vpop.xlane.xlu1 %1709 }
 0x724   :  { %1789 = vst [vmem:[%s4237_s11 + $0x30] sm:$0xff] %v1773_v3  ;;  %3050 = vlog2.f32 %v1710_v44  ;;  %v1708_v62 = vpop.xlane.xlu0 %1707 }
 0x725   :  { %3052 = vlog2.f32 %v1708_v62 }
 0x727   :  { %v1714_v31 = vpop.xlane.xlu1 %1713 }
 0x728   :  { %3054 = vlog2.f32 %v1714_v31  ;;  %v1712_v45 = vpop.xlane.xlu0 %1711 }
 0x729   :  { %3056 = vlog2.f32 %v1712_v45 }
 0x72a   :  { %v3047_v41 = vpop.eup %3046 }
 0x72b   :  { %v3049_v50 = vpop.eup %3048  ;;  %v1738_v54 = vmul.f32 0.6931472, %v3047_v41  ;;  %v1718_v43 = vpop.xlane.xlu1 %1717 }
 0x72c   :  { %v1736_v59 = vmul.f32 0.6931472, %v3049_v50  ;;  %3058 = vlog2.f32 %v1718_v43  ;;  %v1716_v13 = vpop.xlane.xlu0 %1715 }
 0x72d   :  { %v1760_v8 = vadd.f32 %v1738_v54, %v4094_v18  ;;  %3060 = vlog2.f32 %v1716_v13 }
 0x72e   :  { %v3051_v11 = vpop.eup %3050  ;;  %v1759_v23 = vadd.f32 %v1736_v59, %v4098_v27 }
 0x72f   :  { %v3053_v35 = vpop.eup %3052  ;;  %v1776_v17 = vsub.f32 %v3983_v4, %v1760_v8  ;;  %v1742_v21 = vmul.f32 0.6931472, %v3051_v11 }
 0x730   :  { %v1775_v49 = vsub.f32 %v3986_v10, %v1759_v23  ;;  %v1740_v34 = vmul.f32 0.6931472, %v3053_v35 }
 0x731   :  { %1792 = vst [vmem:[%s4237_s11 + $0x48] sm:$0xff] %v1776_v17  ;;  %v1762_v42 = vadd.f32 %v1742_v21, %v4106_v5 }
 0x732   :  { %v3055_v37 = vpop.eup %3054  ;;  %1791 = vst [vmem:[%s4237_s11 + $0x40] sm:$0xff] %v1775_v49  ;;  %v1761_v18 = vadd.f32 %v1740_v34, %v4110_v6 }
 0x733   :  { %v3057_v27 = vpop.eup %3056  ;;  %v1778_v4 = vsub.f32 %v4000_v30, %v1762_v42  ;;  %v1746_v19 = vmul.f32 0.6931472, %v3055_v37 }
 0x734   :  { %v1777_v10 = vsub.f32 %v4004_v40, %v1761_v18  ;;  %v1744_v22 = vmul.f32 0.6931472, %v3057_v27 }
 0x735   :  { %1794 = vst [vmem:[%s4237_s11 + $0x58] sm:$0xff] %v1778_v4  ;;  %v1764_v5 = vadd.f32 %v1746_v19, %v4114_v29 }
 0x736   :  { %v3059_v53 = vpop.eup %3058  ;;  %1793 = vst [vmem:[%s4237_s11 + $0x50] sm:$0xff] %v1777_v10  ;;  %v1763_v6 = vadd.f32 %v1744_v22, %v4118_v16 }
 0x737   :  { %v3061_v56 = vpop.eup %3060  ;;  %v1780_v30 = vsub.f32 %v4018_v47, %v1764_v5  ;;  %v1750_v28 = vmul.f32 0.6931472, %v3059_v53 }
 0x738   :  { %v1779_v40 = vsub.f32 %v4022_v32, %v1763_v6  ;;  %v1748_v24 = vmul.f32 0.6931472, %v3061_v56 }
 0x739   :  { %1796 = vst [vmem:[%s4237_s11 + $0x68] sm:$0xff] %v1780_v30  ;;  %v1766_v29 = vadd.f32 %v1750_v28, %v4122_v38 }
 0x73a   :  { %1795 = vst [vmem:[%s4237_s11 + $0x60] sm:$0xff] %v1779_v40  ;;  %v1765_v63 = vadd.f32 %v1748_v24, %v4126_v15 }
 0x73b   :  { %v1782_v16 = vsub.f32 %v4036_v46, %v1766_v29 }
 0x73c   :  { %v1781_v47 = vsub.f32 %v4040_v2, %v1765_v63 }
 0x73d   :  { %1798 = vst [vmem:[%s4237_s11 + $0x78] sm:$0xff] %v1782_v16 }
 0x73e   :  { %1797 = vst [vmem:[%s4237_s11 + $0x70] sm:$0xff] %v1781_v47 }

</bundles_post_ra>
